<compile_context>
chip_gen: v7x
topology: tpu7x:2x2x1
jax: 0.10.0
libtpu: 0.0.40
codegen_flags: <defaults>
</compile_context>

<pallas_src>
import math

import jax
import jax.numpy as jnp
from jax import lax
from jax.experimental import pallas as pl
from jax.experimental.pallas import tpu as pltpu

# ----------------------------- small BERT config -----------------------------
VOCAB = 100
VOCAB_PAD = 128              # pad vocab to a full lane width for the one-hot matmul
TYPE_VOCAB = 2
MAX_POS = 16
BATCH = 2
SEQ = 8
HIDDEN = 32
NUM_HEADS = 2
HEAD_DIM = HIDDEN // NUM_HEADS
INTERMEDIATE = 64
NUM_LAYERS = 2
LN_EPS = 1e-12
BS = BATCH * SEQ
ROWS = NUM_HEADS * BS        # head-folded attention rows
NEG_BIAS = -10000.0          # HF BERT extended-attention-mask bias
LOG2_SEQ = 3
assert (1 << LOG2_SEQ) == SEQ


# ----------------------------- in-kernel helpers -----------------------------
def _layernorm(x, gamma, beta):
    # x: [R, H] f32, gamma/beta: [1, H] f32
    mean = jnp.mean(x, axis=-1, keepdims=True)
    cen = x - mean
    var = jnp.mean(cen * cen, axis=-1, keepdims=True)
    inv = lax.rsqrt(var + LN_EPS)
    return cen * inv * gamma + beta


def _gelu(x):
    # TODO(synk): HF BERT default uses exact erf-GELU; tanh approximation used
    # here for safe Mosaic lowering (difference is ~1e-3 relative).
    c = math.sqrt(2.0 / math.pi)
    return 0.5 * x * (1.0 + jnp.tanh(c * (x + 0.044715 * x * x * x)))


# ----------------------------- fused TextNet kernel --------------------------
def fused_textnet_kernel(ts_ref, inmask_ref, wemb_ref, embvecs_ref,
                         wqkv_ref, wo_ref, w1_ref, w2_ref, vecs_ref, o_ref):
    """Whole BERT forward (embeddings + encoder) in one program.

    ts_ref     : [BS, 2]  int32    col 0 = token id, col 1 = segment id
    inmask_ref : [1, BS]  f32      attention mask (1 = valid, 0 = pad)
    wemb_ref   : [128, H] f32      word embedding table (vocab zero-padded)
    embvecs_ref: [S+4, H] f32      rows 0..S-1 pos emb, S..S+1 type emb,
                                   S+2 emb LN gamma, S+3 emb LN beta
    wqkv_ref   : [L, H, 3H] bf16   fused Q|K|V projection
    wo_ref     : [L, H, H]  bf16   attention output projection
    w1_ref     : [L, H, I]  bf16   FFN up
    w2_ref     : [L, I, H]  bf16   FFN down
    vecs_ref   : [L, 8, 3H] f32    rows: bqkv | bo | ln1_g | ln1_b | b1 | b2 |
                                         ln2_g | ln2_b   (lane-padded to 3H)
    o_ref      : [BS, H]    f32    last_hidden_state (batch*seq flattened)
    """
    H, I, hd = HIDDEN, INTERMEDIATE, HEAD_DIM

    # ---- embeddings: one-hot word lookup on the MXU + pos/type VPU adds -----
    ts = ts_ref[...]                                   # (BS, 2) int32
    tok = ts[:, 0:1]                                   # (BS, 1)
    seg = ts[:, 1:2].astype(jnp.float32)               # (BS, 1)

    vocab_iota = lax.broadcasted_iota(jnp.int32, (BS, VOCAB_PAD), 1)
    onehot = (vocab_iota == tok).astype(jnp.float32)   # (BS, 128)
    word = jnp.dot(onehot, wemb_ref[...], preferred_element_type=jnp.float32)

    ev = embvecs_ref[...]                              # (S+4, H)
    pos = jnp.concatenate([ev[0:SEQ, :]] * BATCH, axis=0)          # (BS, H)
    type0 = ev[SEQ:SEQ + 1, :]
    type1 = ev[SEQ + 1:SEQ + 2, :]
    typ = type0 + seg * (type1 - type0)                # (BS, H)
    emb_g = ev[SEQ + 2:SEQ + 3, :]
    emb_b = ev[SEQ + 3:SEQ + 4, :]

    x = _layernorm(word + pos + typ, emb_g, emb_b)     # (BS, H) f32

    # ---- additive bias for the head-folded (ROWS, ROWS) score matrix --------
    # Folded row index = head*BS + batch*SEQ + pos, so (idx >> log2(SEQ)) is a
    # unique (head, batch) group id; off-group blocks get the -10000 bias and
    # in-group padded keys get the HF (1 - mask) * -10000 bias.
    ri = lax.broadcasted_iota(jnp.int32, (ROWS, ROWS), 0)
    ci = lax.broadcasted_iota(jnp.int32, (ROWS, ROWS), 1)
    same_group = jnp.right_shift(ri, LOG2_SEQ) == jnp.right_shift(ci, LOG2_SEQ)
    kp = (1.0 - inmask_ref[...]) * NEG_BIAS                        # (1, BS)
    kp_ext = jnp.concatenate([kp] * NUM_HEADS, axis=1)             # (1, ROWS)
    bias = jnp.where(same_group, jnp.broadcast_to(kp_ext, (ROWS, ROWS)),
                     NEG_BIAS)                                     # (ROWS, ROWS)

    scale = 1.0 / math.sqrt(hd)

    for l in range(NUM_LAYERS):                        # static unroll over layers
        vl = vecs_ref[l]                               # (8, 3H) f32
        bqkv = vl[0:1, :]                              # (1, 3H)
        bo = vl[1:2, 0:H]
        ln1g = vl[2:3, 0:H]
        ln1b = vl[3:4, 0:H]
        b1 = vl[4:5, 0:I]
        b2 = vl[5:6, 0:H]
        ln2g = vl[6:7, 0:H]
        ln2b = vl[7:8, 0:H]

        # fused QKV projection: one bf16 matmul, f32 accumulation
        qkv = jnp.dot(x.astype(jnp.bfloat16), wqkv_ref[l],
                      preferred_element_type=jnp.float32) + bqkv   # (BS, 3H)
        q = qkv[:, 0:H]
        k = qkv[:, H:2 * H]
        v = qkv[:, 2 * H:3 * H]

        # fold heads into the row (sublane) dim: (BS, H) -> (NH*BS, hd)
        q_f = jnp.concatenate(
            [q[:, h * hd:(h + 1) * hd] for h in range(NUM_HEADS)], axis=0)
        k_f = jnp.concatenate(
            [k[:, h * hd:(h + 1) * hd] for h in range(NUM_HEADS)], axis=0)
        v_f = jnp.concatenate(
            [v[:, h * hd:(h + 1) * hd] for h in range(NUM_HEADS)], axis=0)

        # single score matmul for all heads/batches; mask kills cross blocks
        s = lax.dot_general(q_f.astype(jnp.bfloat16), k_f.astype(jnp.bfloat16),
                            (((1,), (1,)), ((), ())),
                            preferred_element_type=jnp.float32)    # (ROWS, ROWS)
        s = s * scale + bias
        s = s - jnp.max(s, axis=-1, keepdims=True)
        p = jnp.exp(s)
        p = p * pl.reciprocal(jnp.sum(p, axis=-1, keepdims=True), approx=True)

        # single context matmul, then unfold heads back onto lanes
        ctx = jnp.dot(p.astype(jnp.bfloat16), v_f.astype(jnp.bfloat16),
                      preferred_element_type=jnp.float32)          # (ROWS, hd)
        ctx_u = jnp.concatenate(
            [ctx[h * BS:(h + 1) * BS, :] for h in range(NUM_HEADS)], axis=1)

        # merged output projection: one (BS,H)x(H,H) matmul
        attn = jnp.dot(ctx_u.astype(jnp.bfloat16), wo_ref[l],
                       preferred_element_type=jnp.float32) + bo

        x1 = _layernorm(x + attn, ln1g, ln1b)
        hmid = _gelu(jnp.dot(x1.astype(jnp.bfloat16), w1_ref[l],
                             preferred_element_type=jnp.float32) + b1)
        ffn = jnp.dot(hmid.astype(jnp.bfloat16), w2_ref[l],
                      preferred_element_type=jnp.float32) + b2
        x = _layernorm(x1 + ffn, ln2g, ln2b)

    # TODO(synk): output last dim is H=32 (<128 lanes) by module semantics;
    # the single masked store is negligible in the fused kernel.
    o_ref[...] = x


# ----------------------------- parameter init & packing ----------------------
def init_params(key):
    keys = iter(jax.random.split(key, 64))

    def w(shape, std=0.02):
        return (std * jax.random.normal(next(keys), shape)).astype(jnp.float32)

    params = {
        "word_emb": w((VOCAB, HIDDEN)),
        "pos_emb": w((MAX_POS, HIDDEN)),
        "type_emb": w((TYPE_VOCAB, HIDDEN)),
        "emb_ln_g": jnp.ones((1, HIDDEN), jnp.float32),
        "emb_ln_b": jnp.zeros((1, HIDDEN), jnp.float32),
        "layers": [],
    }
    for _ in range(NUM_LAYERS):
        params["layers"].append({
            "wq": w((HIDDEN, HIDDEN)), "bq": jnp.zeros((1, HIDDEN), jnp.float32),
            "wk": w((HIDDEN, HIDDEN)), "bk": jnp.zeros((1, HIDDEN), jnp.float32),
            "wv": w((HIDDEN, HIDDEN)), "bv": jnp.zeros((1, HIDDEN), jnp.float32),
            "wo": w((HIDDEN, HIDDEN)), "bo": jnp.zeros((1, HIDDEN), jnp.float32),
            "ln1_g": jnp.ones((1, HIDDEN), jnp.float32),
            "ln1_b": jnp.zeros((1, HIDDEN), jnp.float32),
            "w1": w((HIDDEN, INTERMEDIATE)),
            "b1": jnp.zeros((1, INTERMEDIATE), jnp.float32),
            "w2": w((INTERMEDIATE, HIDDEN)),
            "b2": jnp.zeros((1, HIDDEN), jnp.float32),
            "ln2_g": jnp.ones((1, HIDDEN), jnp.float32),
            "ln2_b": jnp.zeros((1, HIDDEN), jnp.float32),
        })
    return params


def pack_params(params):
    """Fuse QKV weights, pack small per-layer vectors, cast matmul weights to bf16."""
    H3 = 3 * HIDDEN

    def pad_lanes(v, width):
        return jnp.pad(v, ((0, 0), (0, width - v.shape[1])))

    wqkv, wo, w1, w2, vecs = [], [], [], [], []
    for lp in params["layers"]:
        wqkv.append(jnp.concatenate([lp["wq"], lp["wk"], lp["wv"]], axis=1))  # (H, 3H)
        wo.append(lp["wo"])
        w1.append(lp["w1"])
        w2.append(lp["w2"])
        bqkv = jnp.concatenate([lp["bq"], lp["bk"], lp["bv"]], axis=1)        # (1, 3H)
        vecs.append(jnp.concatenate([
            bqkv,
            pad_lanes(lp["bo"], H3),
            pad_lanes(lp["ln1_g"], H3),
            pad_lanes(lp["ln1_b"], H3),
            pad_lanes(lp["b1"], H3),
            pad_lanes(lp["b2"], H3),
            pad_lanes(lp["ln2_g"], H3),
            pad_lanes(lp["ln2_b"], H3),
        ], axis=0))                                                            # (8, 3H)

    word_emb_pad = jnp.pad(params["word_emb"], ((0, VOCAB_PAD - VOCAB), (0, 0)))
    embvecs = jnp.concatenate([
        params["pos_emb"][:SEQ],      # rows 0..S-1
        params["type_emb"],           # rows S, S+1
        params["emb_ln_g"],           # row S+2
        params["emb_ln_b"],           # row S+3
    ], axis=0)                        # (S+4, H)

    return {
        "wemb": word_emb_pad.astype(jnp.float32),
        "embvecs": embvecs.astype(jnp.float32),
        "wqkv": jnp.stack(wqkv).astype(jnp.bfloat16),   # (L, H, 3H)
        "wo": jnp.stack(wo).astype(jnp.bfloat16),       # (L, H, H)
        "w1": jnp.stack(w1).astype(jnp.bfloat16),       # (L, H, I)
        "w2": jnp.stack(w2).astype(jnp.bfloat16),       # (L, I, H)
        "vecs": jnp.stack(vecs).astype(jnp.float32),    # (L, 8, 3H)
    }


# ----------------------------- TextNet.forward -------------------------------
def textnet_forward(packed, tokens, segments, input_masks):
    """Returns last_hidden_state: [B, S, H] float32 (== output[0] in PyTorch)."""
    B, S = tokens.shape
    # Tiny int repack only; everything else (embedding lookup, mask build,
    # encoder) happens inside the single pallas_call.
    ts = jnp.stack([tokens.reshape(-1), segments.reshape(-1)],
                   axis=1).astype(jnp.int32)                    # (BS, 2)
    inmask = input_masks.astype(jnp.float32).reshape(1, B * S)  # (1, BS)

    out = pl.pallas_call(
        fused_textnet_kernel,
        out_shape=jax.ShapeDtypeStruct((B * S, HIDDEN), jnp.float32),
        in_specs=[pl.BlockSpec(memory_space=pltpu.MemorySpace.VMEM)
                  for _ in range(9)],
        out_specs=pl.BlockSpec(memory_space=pltpu.MemorySpace.VMEM),
    )(ts, inmask, packed["wemb"], packed["embvecs"], packed["wqkv"],
      packed["wo"], packed["w1"], packed["w2"], packed["vecs"])

    return out.reshape(B, S, HIDDEN)


if __name__ == "__main__":
    root = jax.random.PRNGKey(0)
    kp, kt, ks, km = jax.random.split(root, 4)

    params = init_params(kp)
    packed = pack_params(params)

    tokens = jax.random.randint(kt, (BATCH, SEQ), 0, VOCAB, dtype=jnp.int32)
    segments = jnp.concatenate(
        [jnp.zeros((BATCH, SEQ // 2), jnp.int32),
         jnp.ones((BATCH, SEQ - SEQ // 2), jnp.int32)], axis=1)
    # batch 0 fully valid, batch 1 has 2 padding positions at the end
    input_masks = jnp.array(
        [[1] * SEQ, [1] * (SEQ - 2) + [0] * 2], dtype=jnp.int32)

    forward = jax.jit(textnet_forward)
    out = jax.block_until_ready(forward(packed, tokens, segments, input_masks))

    assert out.shape == (BATCH, SEQ, HIDDEN)
    assert out.dtype == jnp.float32
    assert bool(jnp.all(jnp.isfinite(out)))
    print("KERNEL_OK")
</pallas_src>

<mosaic_0001>
module attributes {stable_mosaic.version = 11 : i64} {
  func.func @fused_textnet_kernel(%arg0: memref<16x2xi32, #tpu.memory_space<vmem>>, %arg1: memref<1x16xf32, #tpu.memory_space<vmem>>, %arg2: memref<128x32xf32, #tpu.memory_space<vmem>>, %arg3: memref<12x32xf32, #tpu.memory_space<vmem>>, %arg4: memref<2x32x96xbf16, #tpu.memory_space<vmem>>, %arg5: memref<2x32x32xbf16, #tpu.memory_space<vmem>>, %arg6: memref<2x32x64xbf16, #tpu.memory_space<vmem>>, %arg7: memref<2x64x32xbf16, #tpu.memory_space<vmem>>, %arg8: memref<2x8x96xf32, #tpu.memory_space<vmem>>, %arg9: memref<16x32xf32, #tpu.memory_space<vmem>>) attributes {dimension_semantics = [], scalar_prefetch = 0 : i64, scratch_operands = 0 : i64, tpu.core_type = #tpu.core_type<tc>} {
    %c0 = arith.constant 0 : index
    %c0_0 = arith.constant 0 : index
    %0 = vector.load %arg0[%c0, %c0_0] : memref<16x2xi32, #tpu.memory_space<vmem>>, vector<16x2xi32>
    %1 = vector.extract_strided_slice %0 {offsets = [0, 0], sizes = [16, 1], strides = [1, 1]} : vector<16x2xi32> to vector<16x1xi32>
    %2 = vector.extract_strided_slice %0 {offsets = [0, 1], sizes = [16, 1], strides = [1, 1]} : vector<16x2xi32> to vector<16x1xi32>
    %3 = arith.sitofp %2 : vector<16x1xi32> to vector<16x1xf32>
    %4 = tpu.iota {dimensions = array<i32: 1>} : vector<16x128xi32>
    %5 = vector.broadcast %1 : vector<16x1xi32> to vector<16x128xi32>
    %6 = arith.cmpi eq, %4, %5 : vector<16x128xi32>
    %7 = arith.extui %6 : vector<16x128xi1> to vector<16x128xi32>
    %8 = arith.sitofp %7 : vector<16x128xi32> to vector<16x128xf32>
    %c0_1 = arith.constant 0 : index
    %c0_2 = arith.constant 0 : index
    %9 = vector.load %arg2[%c0_1, %c0_2] : memref<128x32xf32, #tpu.memory_space<vmem>>, vector<128x32xf32>
    %cst = arith.constant dense<0.000000e+00> : vector<16x32xf32>
    %10 = tpu.matmul %8, %9, %cst {dimension_numbers = #tpu.dot_dimension_numbers<[1], [0], [0], [1], [0, 0, 1, 1], [], []>} : vector<16x128xf32>, vector<128x32xf32>, vector<16x32xf32> -> vector<16x32xf32>
    %c0_3 = arith.constant 0 : index
    %c0_4 = arith.constant 0 : index
    %11 = vector.load %arg3[%c0_3, %c0_4] : memref<12x32xf32, #tpu.memory_space<vmem>>, vector<12x32xf32>
    %12 = vector.extract_strided_slice %11 {offsets = [0, 0], sizes = [8, 32], strides = [1, 1]} : vector<12x32xf32> to vector<8x32xf32>
    %13 = tpu.concatenate %12, %12 in 0 : vector<8x32xf32>, vector<8x32xf32> -> vector<16x32xf32>
    %14 = vector.extract_strided_slice %11 {offsets = [8, 0], sizes = [1, 32], strides = [1, 1]} : vector<12x32xf32> to vector<1x32xf32>
    %15 = vector.extract_strided_slice %11 {offsets = [9, 0], sizes = [1, 32], strides = [1, 1]} : vector<12x32xf32> to vector<1x32xf32>
    %16 = arith.subf %15, %14 : vector<1x32xf32>
    %17 = vector.broadcast %3 : vector<16x1xf32> to vector<16x32xf32>
    %18 = vector.broadcast %16 : vector<1x32xf32> to vector<16x32xf32>
    %19 = arith.mulf %17, %18 : vector<16x32xf32>
    %20 = vector.broadcast %14 : vector<1x32xf32> to vector<16x32xf32>
    %21 = arith.addf %20, %19 : vector<16x32xf32>
    %22 = vector.extract_strided_slice %11 {offsets = [10, 0], sizes = [1, 32], strides = [1, 1]} : vector<12x32xf32> to vector<1x32xf32>
    %23 = vector.extract_strided_slice %11 {offsets = [11, 0], sizes = [1, 32], strides = [1, 1]} : vector<12x32xf32> to vector<1x32xf32>
    %24 = arith.addf %10, %13 : vector<16x32xf32>
    %25 = arith.addf %24, %21 : vector<16x32xf32>
    %cst_5 = arith.constant dense<0.000000e+00> : vector<16xf32>
    %26 = vector.multi_reduction <add>, %25, %cst_5 [1] : vector<16x32xf32> to vector<16xf32>
    %27 = vector.shape_cast %26 : vector<16xf32> to vector<16x1xf32>
    %cst_6 = arith.constant 3.200000e+01 : f32
    %28 = vector.broadcast %cst_6 : f32 to vector<16x1xf32>
    %29 = arith.divf %27, %28 : vector<16x1xf32>
    %30 = vector.broadcast %29 : vector<16x1xf32> to vector<16x32xf32>
    %31 = arith.subf %25, %30 : vector<16x32xf32>
    %32 = arith.mulf %31, %31 : vector<16x32xf32>
    %cst_7 = arith.constant dense<0.000000e+00> : vector<16xf32>
    %33 = vector.multi_reduction <add>, %32, %cst_7 [1] : vector<16x32xf32> to vector<16xf32>
    %34 = vector.shape_cast %33 : vector<16xf32> to vector<16x1xf32>
    %cst_8 = arith.constant 3.200000e+01 : f32
    %35 = vector.broadcast %cst_8 : f32 to vector<16x1xf32>
    %36 = arith.divf %34, %35 : vector<16x1xf32>
    %cst_9 = arith.constant 9.99999996E-13 : f32
    %37 = vector.broadcast %cst_9 : f32 to vector<16x1xf32>
    %38 = arith.addf %36, %37 : vector<16x1xf32>
    %39 = math.rsqrt %38 : vector<16x1xf32>
    %40 = vector.broadcast %39 : vector<16x1xf32> to vector<16x32xf32>
    %41 = arith.mulf %31, %40 : vector<16x32xf32>
    %42 = vector.broadcast %22 : vector<1x32xf32> to vector<16x32xf32>
    %43 = arith.mulf %41, %42 : vector<16x32xf32>
    %44 = vector.broadcast %23 : vector<1x32xf32> to vector<16x32xf32>
    %45 = arith.addf %43, %44 : vector<16x32xf32>
    %46 = tpu.iota {dimensions = array<i32: 0>} : vector<32x32xi32>
    %47 = tpu.iota {dimensions = array<i32: 1>} : vector<32x32xi32>
    %c3_i32 = arith.constant 3 : i32
    %48 = vector.broadcast %c3_i32 : i32 to vector<32x32xi32>
    %49 = arith.shrsi %46, %48 : vector<32x32xi32>
    %c3_i32_10 = arith.constant 3 : i32
    %50 = vector.broadcast %c3_i32_10 : i32 to vector<32x32xi32>
    %51 = arith.shrsi %47, %50 : vector<32x32xi32>
    %52 = arith.cmpi eq, %49, %51 : vector<32x32xi32>
    %c0_11 = arith.constant 0 : index
    %c0_12 = arith.constant 0 : index
    %53 = vector.load %arg1[%c0_11, %c0_12] : memref<1x16xf32, #tpu.memory_space<vmem>>, vector<1x16xf32>
    %cst_13 = arith.constant 1.000000e+00 : f32
    %54 = vector.broadcast %cst_13 : f32 to vector<1x16xf32>
    %55 = arith.subf %54, %53 : vector<1x16xf32>
    %cst_14 = arith.constant -1.000000e+04 : f32
    %56 = vector.broadcast %cst_14 : f32 to vector<1x16xf32>
    %57 = arith.mulf %55, %56 : vector<1x16xf32>
    %58 = tpu.concatenate %57, %57 in 1 : vector<1x16xf32>, vector<1x16xf32> -> vector<1x32xf32>
    %59 = vector.shape_cast %58 : vector<1x32xf32> to vector<1x32xf32>
    %60 = vector.broadcast %59 : vector<1x32xf32> to vector<32x32xf32>
    %cst_15 = arith.constant -1.000000e+04 : f32
    %61 = vector.broadcast %cst_15 : f32 to vector<32x32xf32>
    %62 = arith.select %52, %60, %61 : vector<32x32xi1>, vector<32x32xf32>
    %c0_16 = arith.constant 0 : index
    %c0_17 = arith.constant 0 : index
    %c0_18 = arith.constant 0 : index
    %63 = vector.load %arg8[%c0_16, %c0_17, %c0_18] : memref<2x8x96xf32, #tpu.memory_space<vmem>>, vector<1x8x96xf32>
    %64 = vector.shape_cast %63 : vector<1x8x96xf32> to vector<8x96xf32>
    %65 = vector.extract_strided_slice %64 {offsets = [0, 0], sizes = [1, 96], strides = [1, 1]} : vector<8x96xf32> to vector<1x96xf32>
    %66 = vector.extract_strided_slice %64 {offsets = [1, 0], sizes = [1, 32], strides = [1, 1]} : vector<8x96xf32> to vector<1x32xf32>
    %67 = vector.extract_strided_slice %64 {offsets = [2, 0], sizes = [1, 32], strides = [1, 1]} : vector<8x96xf32> to vector<1x32xf32>
    %68 = vector.extract_strided_slice %64 {offsets = [3, 0], sizes = [1, 32], strides = [1, 1]} : vector<8x96xf32> to vector<1x32xf32>
    %69 = vector.extract_strided_slice %64 {offsets = [4, 0], sizes = [1, 64], strides = [1, 1]} : vector<8x96xf32> to vector<1x64xf32>
    %70 = vector.extract_strided_slice %64 {offsets = [5, 0], sizes = [1, 32], strides = [1, 1]} : vector<8x96xf32> to vector<1x32xf32>
    %71 = vector.extract_strided_slice %64 {offsets = [6, 0], sizes = [1, 32], strides = [1, 1]} : vector<8x96xf32> to vector<1x32xf32>
    %72 = vector.extract_strided_slice %64 {offsets = [7, 0], sizes = [1, 32], strides = [1, 1]} : vector<8x96xf32> to vector<1x32xf32>
    %73 = arith.truncf %45 : vector<16x32xf32> to vector<16x32xbf16>
    %c0_19 = arith.constant 0 : index
    %c0_20 = arith.constant 0 : index
    %c0_21 = arith.constant 0 : index
    %74 = vector.load %arg4[%c0_19, %c0_20, %c0_21] : memref<2x32x96xbf16, #tpu.memory_space<vmem>>, vector<1x32x96xbf16>
    %75 = vector.shape_cast %74 : vector<1x32x96xbf16> to vector<32x96xbf16>
    %cst_22 = arith.constant dense<0.000000e+00> : vector<16x96xf32>
    %76 = tpu.matmul %73, %75, %cst_22 {dimension_numbers = #tpu.dot_dimension_numbers<[1], [0], [0], [1], [0, 0, 1, 1], [], []>} : vector<16x32xbf16>, vector<32x96xbf16>, vector<16x96xf32> -> vector<16x96xf32>
    %77 = vector.broadcast %65 : vector<1x96xf32> to vector<16x96xf32>
    %78 = arith.addf %76, %77 : vector<16x96xf32>
    %79 = vector.extract_strided_slice %78 {offsets = [0, 0], sizes = [16, 32], strides = [1, 1]} : vector<16x96xf32> to vector<16x32xf32>
    %80 = vector.extract_strided_slice %78 {offsets = [0, 32], sizes = [16, 32], strides = [1, 1]} : vector<16x96xf32> to vector<16x32xf32>
    %81 = vector.extract_strided_slice %78 {offsets = [0, 64], sizes = [16, 32], strides = [1, 1]} : vector<16x96xf32> to vector<16x32xf32>
    %82 = vector.extract_strided_slice %79 {offsets = [0, 0], sizes = [16, 16], strides = [1, 1]} : vector<16x32xf32> to vector<16x16xf32>
    %83 = vector.extract_strided_slice %79 {offsets = [0, 16], sizes = [16, 16], strides = [1, 1]} : vector<16x32xf32> to vector<16x16xf32>
    %84 = tpu.concatenate %82, %83 in 0 : vector<16x16xf32>, vector<16x16xf32> -> vector<32x16xf32>
    %85 = vector.extract_strided_slice %80 {offsets = [0, 0], sizes = [16, 16], strides = [1, 1]} : vector<16x32xf32> to vector<16x16xf32>
    %86 = vector.extract_strided_slice %80 {offsets = [0, 16], sizes = [16, 16], strides = [1, 1]} : vector<16x32xf32> to vector<16x16xf32>
    %87 = tpu.concatenate %85, %86 in 0 : vector<16x16xf32>, vector<16x16xf32> -> vector<32x16xf32>
    %88 = vector.extract_strided_slice %81 {offsets = [0, 0], sizes = [16, 16], strides = [1, 1]} : vector<16x32xf32> to vector<16x16xf32>
    %89 = vector.extract_strided_slice %81 {offsets = [0, 16], sizes = [16, 16], strides = [1, 1]} : vector<16x32xf32> to vector<16x16xf32>
    %90 = tpu.concatenate %88, %89 in 0 : vector<16x16xf32>, vector<16x16xf32> -> vector<32x16xf32>
    %91 = arith.truncf %84 : vector<32x16xf32> to vector<32x16xbf16>
    %92 = arith.truncf %87 : vector<32x16xf32> to vector<32x16xbf16>
    %cst_23 = arith.constant dense<0.000000e+00> : vector<32x32xf32>
    %93 = tpu.matmul %91, %92, %cst_23 {dimension_numbers = #tpu.dot_dimension_numbers<[1], [1], [0], [0], [0, 0, 1, 0], [], []>} : vector<32x16xbf16>, vector<32x16xbf16>, vector<32x32xf32> -> vector<32x32xf32>
    %cst_24 = arith.constant 2.500000e-01 : f32
    %94 = vector.broadcast %cst_24 : f32 to vector<32x32xf32>
    %95 = arith.mulf %93, %94 : vector<32x32xf32>
    %96 = arith.addf %95, %62 : vector<32x32xf32>
    %cst_25 = arith.constant dense<0xFF800000> : vector<32xf32>
    %97 = vector.multi_reduction <maximumf>, %96, %cst_25 [1] : vector<32x32xf32> to vector<32xf32>
    %98 = vector.shape_cast %97 : vector<32xf32> to vector<32x1xf32>
    %99 = vector.broadcast %98 : vector<32x1xf32> to vector<32x32xf32>
    %100 = arith.subf %96, %99 : vector<32x32xf32>
    %101 = math.exp %100 : vector<32x32xf32>
    %cst_26 = arith.constant dense<0.000000e+00> : vector<32xf32>
    %102 = vector.multi_reduction <add>, %101, %cst_26 [1] : vector<32x32xf32> to vector<32xf32>
    %103 = vector.shape_cast %102 : vector<32xf32> to vector<32x1xf32>
    %104 = tpu.reciprocal %103 {approx = true} : vector<32x1xf32> -> vector<32x1xf32>
    %105 = vector.broadcast %104 : vector<32x1xf32> to vector<32x32xf32>
    %106 = arith.mulf %101, %105 : vector<32x32xf32>
    %107 = arith.truncf %106 : vector<32x32xf32> to vector<32x32xbf16>
    %108 = arith.truncf %90 : vector<32x16xf32> to vector<32x16xbf16>
    %cst_27 = arith.constant dense<0.000000e+00> : vector<32x16xf32>
    %109 = tpu.matmul %107, %108, %cst_27 {dimension_numbers = #tpu.dot_dimension_numbers<[1], [0], [0], [1], [0, 0, 1, 1], [], []>} : vector<32x32xbf16>, vector<32x16xbf16>, vector<32x16xf32> -> vector<32x16xf32>
    %110 = vector.extract_strided_slice %109 {offsets = [0, 0], sizes = [16, 16], strides = [1, 1]} : vector<32x16xf32> to vector<16x16xf32>
    %111 = vector.extract_strided_slice %109 {offsets = [16, 0], sizes = [16, 16], strides = [1, 1]} : vector<32x16xf32> to vector<16x16xf32>
    %112 = tpu.concatenate %110, %111 in 1 : vector<16x16xf32>, vector<16x16xf32> -> vector<16x32xf32>
    %113 = arith.truncf %112 : vector<16x32xf32> to vector<16x32xbf16>
    %c0_28 = arith.constant 0 : index
    %c0_29 = arith.constant 0 : index
    %c0_30 = arith.constant 0 : index
    %114 = vector.load %arg5[%c0_28, %c0_29, %c0_30] : memref<2x32x32xbf16, #tpu.memory_space<vmem>>, vector<1x32x32xbf16>
    %115 = vector.shape_cast %114 : vector<1x32x32xbf16> to vector<32x32xbf16>
    %cst_31 = arith.constant dense<0.000000e+00> : vector<16x32xf32>
    %116 = tpu.matmul %113, %115, %cst_31 {dimension_numbers = #tpu.dot_dimension_numbers<[1], [0], [0], [1], [0, 0, 1, 1], [], []>} : vector<16x32xbf16>, vector<32x32xbf16>, vector<16x32xf32> -> vector<16x32xf32>
    %117 = vector.broadcast %66 : vector<1x32xf32> to vector<16x32xf32>
    %118 = arith.addf %116, %117 : vector<16x32xf32>
    %119 = arith.addf %45, %118 : vector<16x32xf32>
    %cst_32 = arith.constant dense<0.000000e+00> : vector<16xf32>
    %120 = vector.multi_reduction <add>, %119, %cst_32 [1] : vector<16x32xf32> to vector<16xf32>
    %121 = vector.shape_cast %120 : vector<16xf32> to vector<16x1xf32>
    %cst_33 = arith.constant 3.200000e+01 : f32
    %122 = vector.broadcast %cst_33 : f32 to vector<16x1xf32>
    %123 = arith.divf %121, %122 : vector<16x1xf32>
    %124 = vector.broadcast %123 : vector<16x1xf32> to vector<16x32xf32>
    %125 = arith.subf %119, %124 : vector<16x32xf32>
    %126 = arith.mulf %125, %125 : vector<16x32xf32>
    %cst_34 = arith.constant dense<0.000000e+00> : vector<16xf32>
    %127 = vector.multi_reduction <add>, %126, %cst_34 [1] : vector<16x32xf32> to vector<16xf32>
    %128 = vector.shape_cast %127 : vector<16xf32> to vector<16x1xf32>
    %cst_35 = arith.constant 3.200000e+01 : f32
    %129 = vector.broadcast %cst_35 : f32 to vector<16x1xf32>
    %130 = arith.divf %128, %129 : vector<16x1xf32>
    %cst_36 = arith.constant 9.99999996E-13 : f32
    %131 = vector.broadcast %cst_36 : f32 to vector<16x1xf32>
    %132 = arith.addf %130, %131 : vector<16x1xf32>
    %133 = math.rsqrt %132 : vector<16x1xf32>
    %134 = vector.broadcast %133 : vector<16x1xf32> to vector<16x32xf32>
    %135 = arith.mulf %125, %134 : vector<16x32xf32>
    %136 = vector.broadcast %67 : vector<1x32xf32> to vector<16x32xf32>
    %137 = arith.mulf %135, %136 : vector<16x32xf32>
    %138 = vector.broadcast %68 : vector<1x32xf32> to vector<16x32xf32>
    %139 = arith.addf %137, %138 : vector<16x32xf32>
    %140 = arith.truncf %139 : vector<16x32xf32> to vector<16x32xbf16>
    %c0_37 = arith.constant 0 : index
    %c0_38 = arith.constant 0 : index
    %c0_39 = arith.constant 0 : index
    %141 = vector.load %arg6[%c0_37, %c0_38, %c0_39] : memref<2x32x64xbf16, #tpu.memory_space<vmem>>, vector<1x32x64xbf16>
    %142 = vector.shape_cast %141 : vector<1x32x64xbf16> to vector<32x64xbf16>
    %cst_40 = arith.constant dense<0.000000e+00> : vector<16x64xf32>
    %143 = tpu.matmul %140, %142, %cst_40 {dimension_numbers = #tpu.dot_dimension_numbers<[1], [0], [0], [1], [0, 0, 1, 1], [], []>} : vector<16x32xbf16>, vector<32x64xbf16>, vector<16x64xf32> -> vector<16x64xf32>
    %144 = vector.broadcast %69 : vector<1x64xf32> to vector<16x64xf32>
    %145 = arith.addf %143, %144 : vector<16x64xf32>
    %cst_41 = arith.constant 5.000000e-01 : f32
    %146 = vector.broadcast %cst_41 : f32 to vector<16x64xf32>
    %147 = arith.mulf %146, %145 : vector<16x64xf32>
    %cst_42 = arith.constant 4.471500e-02 : f32
    %148 = vector.broadcast %cst_42 : f32 to vector<16x64xf32>
    %149 = arith.mulf %148, %145 : vector<16x64xf32>
    %150 = arith.mulf %149, %145 : vector<16x64xf32>
    %151 = arith.mulf %150, %145 : vector<16x64xf32>
    %152 = arith.addf %145, %151 : vector<16x64xf32>
    %cst_43 = arith.constant 0.797884583 : f32
    %153 = vector.broadcast %cst_43 : f32 to vector<16x64xf32>
    %154 = arith.mulf %153, %152 : vector<16x64xf32>
    %155 = math.tanh %154 : vector<16x64xf32>
    %cst_44 = arith.constant 1.000000e+00 : f32
    %156 = vector.broadcast %cst_44 : f32 to vector<16x64xf32>
    %157 = arith.addf %156, %155 : vector<16x64xf32>
    %158 = arith.mulf %147, %157 : vector<16x64xf32>
    %159 = arith.truncf %158 : vector<16x64xf32> to vector<16x64xbf16>
    %c0_45 = arith.constant 0 : index
    %c0_46 = arith.constant 0 : index
    %c0_47 = arith.constant 0 : index
    %160 = vector.load %arg7[%c0_45, %c0_46, %c0_47] : memref<2x64x32xbf16, #tpu.memory_space<vmem>>, vector<1x64x32xbf16>
    %161 = vector.shape_cast %160 : vector<1x64x32xbf16> to vector<64x32xbf16>
    %cst_48 = arith.constant dense<0.000000e+00> : vector<16x32xf32>
    %162 = tpu.matmul %159, %161, %cst_48 {dimension_numbers = #tpu.dot_dimension_numbers<[1], [0], [0], [1], [0, 0, 1, 1], [], []>} : vector<16x64xbf16>, vector<64x32xbf16>, vector<16x32xf32> -> vector<16x32xf32>
    %163 = vector.broadcast %70 : vector<1x32xf32> to vector<16x32xf32>
    %164 = arith.addf %162, %163 : vector<16x32xf32>
    %165 = arith.addf %139, %164 : vector<16x32xf32>
    %cst_49 = arith.constant dense<0.000000e+00> : vector<16xf32>
    %166 = vector.multi_reduction <add>, %165, %cst_49 [1] : vector<16x32xf32> to vector<16xf32>
    %167 = vector.shape_cast %166 : vector<16xf32> to vector<16x1xf32>
    %cst_50 = arith.constant 3.200000e+01 : f32
    %168 = vector.broadcast %cst_50 : f32 to vector<16x1xf32>
    %169 = arith.divf %167, %168 : vector<16x1xf32>
    %170 = vector.broadcast %169 : vector<16x1xf32> to vector<16x32xf32>
    %171 = arith.subf %165, %170 : vector<16x32xf32>
    %172 = arith.mulf %171, %171 : vector<16x32xf32>
    %cst_51 = arith.constant dense<0.000000e+00> : vector<16xf32>
    %173 = vector.multi_reduction <add>, %172, %cst_51 [1] : vector<16x32xf32> to vector<16xf32>
    %174 = vector.shape_cast %173 : vector<16xf32> to vector<16x1xf32>
    %cst_52 = arith.constant 3.200000e+01 : f32
    %175 = vector.broadcast %cst_52 : f32 to vector<16x1xf32>
    %176 = arith.divf %174, %175 : vector<16x1xf32>
    %cst_53 = arith.constant 9.99999996E-13 : f32
    %177 = vector.broadcast %cst_53 : f32 to vector<16x1xf32>
    %178 = arith.addf %176, %177 : vector<16x1xf32>
    %179 = math.rsqrt %178 : vector<16x1xf32>
    %180 = vector.broadcast %179 : vector<16x1xf32> to vector<16x32xf32>
    %181 = arith.mulf %171, %180 : vector<16x32xf32>
    %182 = vector.broadcast %71 : vector<1x32xf32> to vector<16x32xf32>
    %183 = arith.mulf %181, %182 : vector<16x32xf32>
    %184 = vector.broadcast %72 : vector<1x32xf32> to vector<16x32xf32>
    %185 = arith.addf %183, %184 : vector<16x32xf32>
    %c1 = arith.constant 1 : index
    %c0_54 = arith.constant 0 : index
    %c0_55 = arith.constant 0 : index
    %186 = vector.load %arg8[%c1, %c0_54, %c0_55] : memref<2x8x96xf32, #tpu.memory_space<vmem>>, vector<1x8x96xf32>
    %187 = vector.shape_cast %186 : vector<1x8x96xf32> to vector<8x96xf32>
    %188 = vector.extract_strided_slice %187 {offsets = [0, 0], sizes = [1, 96], strides = [1, 1]} : vector<8x96xf32> to vector<1x96xf32>
    %189 = vector.extract_strided_slice %187 {offsets = [1, 0], sizes = [1, 32], strides = [1, 1]} : vector<8x96xf32> to vector<1x32xf32>
    %190 = vector.extract_strided_slice %187 {offsets = [2, 0], sizes = [1, 32], strides = [1, 1]} : vector<8x96xf32> to vector<1x32xf32>
    %191 = vector.extract_strided_slice %187 {offsets = [3, 0], sizes = [1, 32], strides = [1, 1]} : vector<8x96xf32> to vector<1x32xf32>
    %192 = vector.extract_strided_slice %187 {offsets = [4, 0], sizes = [1, 64], strides = [1, 1]} : vector<8x96xf32> to vector<1x64xf32>
    %193 = vector.extract_strided_slice %187 {offsets = [5, 0], sizes = [1, 32], strides = [1, 1]} : vector<8x96xf32> to vector<1x32xf32>
    %194 = vector.extract_strided_slice %187 {offsets = [6, 0], sizes = [1, 32], strides = [1, 1]} : vector<8x96xf32> to vector<1x32xf32>
    %195 = vector.extract_strided_slice %187 {offsets = [7, 0], sizes = [1, 32], strides = [1, 1]} : vector<8x96xf32> to vector<1x32xf32>
    %196 = arith.truncf %185 : vector<16x32xf32> to vector<16x32xbf16>
    %c1_56 = arith.constant 1 : index
    %c0_57 = arith.constant 0 : index
    %c0_58 = arith.constant 0 : index
    %197 = vector.load %arg4[%c1_56, %c0_57, %c0_58] : memref<2x32x96xbf16, #tpu.memory_space<vmem>>, vector<1x32x96xbf16>
    %198 = vector.shape_cast %197 : vector<1x32x96xbf16> to vector<32x96xbf16>
    %cst_59 = arith.constant dense<0.000000e+00> : vector<16x96xf32>
    %199 = tpu.matmul %196, %198, %cst_59 {dimension_numbers = #tpu.dot_dimension_numbers<[1], [0], [0], [1], [0, 0, 1, 1], [], []>} : vector<16x32xbf16>, vector<32x96xbf16>, vector<16x96xf32> -> vector<16x96xf32>
    %200 = vector.broadcast %188 : vector<1x96xf32> to vector<16x96xf32>
    %201 = arith.addf %199, %200 : vector<16x96xf32>
    %202 = vector.extract_strided_slice %201 {offsets = [0, 0], sizes = [16, 32], strides = [1, 1]} : vector<16x96xf32> to vector<16x32xf32>
    %203 = vector.extract_strided_slice %201 {offsets = [0, 32], sizes = [16, 32], strides = [1, 1]} : vector<16x96xf32> to vector<16x32xf32>
    %204 = vector.extract_strided_slice %201 {offsets = [0, 64], sizes = [16, 32], strides = [1, 1]} : vector<16x96xf32> to vector<16x32xf32>
    %205 = vector.extract_strided_slice %202 {offsets = [0, 0], sizes = [16, 16], strides = [1, 1]} : vector<16x32xf32> to vector<16x16xf32>
    %206 = vector.extract_strided_slice %202 {offsets = [0, 16], sizes = [16, 16], strides = [1, 1]} : vector<16x32xf32> to vector<16x16xf32>
    %207 = tpu.concatenate %205, %206 in 0 : vector<16x16xf32>, vector<16x16xf32> -> vector<32x16xf32>
    %208 = vector.extract_strided_slice %203 {offsets = [0, 0], sizes = [16, 16], strides = [1, 1]} : vector<16x32xf32> to vector<16x16xf32>
    %209 = vector.extract_strided_slice %203 {offsets = [0, 16], sizes = [16, 16], strides = [1, 1]} : vector<16x32xf32> to vector<16x16xf32>
    %210 = tpu.concatenate %208, %209 in 0 : vector<16x16xf32>, vector<16x16xf32> -> vector<32x16xf32>
    %211 = vector.extract_strided_slice %204 {offsets = [0, 0], sizes = [16, 16], strides = [1, 1]} : vector<16x32xf32> to vector<16x16xf32>
    %212 = vector.extract_strided_slice %204 {offsets = [0, 16], sizes = [16, 16], strides = [1, 1]} : vector<16x32xf32> to vector<16x16xf32>
    %213 = tpu.concatenate %211, %212 in 0 : vector<16x16xf32>, vector<16x16xf32> -> vector<32x16xf32>
    %214 = arith.truncf %207 : vector<32x16xf32> to vector<32x16xbf16>
    %215 = arith.truncf %210 : vector<32x16xf32> to vector<32x16xbf16>
    %cst_60 = arith.constant dense<0.000000e+00> : vector<32x32xf32>
    %216 = tpu.matmul %214, %215, %cst_60 {dimension_numbers = #tpu.dot_dimension_numbers<[1], [1], [0], [0], [0, 0, 1, 0], [], []>} : vector<32x16xbf16>, vector<32x16xbf16>, vector<32x32xf32> -> vector<32x32xf32>
    %cst_61 = arith.constant 2.500000e-01 : f32
    %217 = vector.broadcast %cst_61 : f32 to vector<32x32xf32>
    %218 = arith.mulf %216, %217 : vector<32x32xf32>
    %219 = arith.addf %218, %62 : vector<32x32xf32>
    %cst_62 = arith.constant dense<0xFF800000> : vector<32xf32>
    %220 = vector.multi_reduction <maximumf>, %219, %cst_62 [1] : vector<32x32xf32> to vector<32xf32>
    %221 = vector.shape_cast %220 : vector<32xf32> to vector<32x1xf32>
    %222 = vector.broadcast %221 : vector<32x1xf32> to vector<32x32xf32>
    %223 = arith.subf %219, %222 : vector<32x32xf32>
    %224 = math.exp %223 : vector<32x32xf32>
    %cst_63 = arith.constant dense<0.000000e+00> : vector<32xf32>
    %225 = vector.multi_reduction <add>, %224, %cst_63 [1] : vector<32x32xf32> to vector<32xf32>
    %226 = vector.shape_cast %225 : vector<32xf32> to vector<32x1xf32>
    %227 = tpu.reciprocal %226 {approx = true} : vector<32x1xf32> -> vector<32x1xf32>
    %228 = vector.broadcast %227 : vector<32x1xf32> to vector<32x32xf32>
    %229 = arith.mulf %224, %228 : vector<32x32xf32>
    %230 = arith.truncf %229 : vector<32x32xf32> to vector<32x32xbf16>
    %231 = arith.truncf %213 : vector<32x16xf32> to vector<32x16xbf16>
    %cst_64 = arith.constant dense<0.000000e+00> : vector<32x16xf32>
    %232 = tpu.matmul %230, %231, %cst_64 {dimension_numbers = #tpu.dot_dimension_numbers<[1], [0], [0], [1], [0, 0, 1, 1], [], []>} : vector<32x32xbf16>, vector<32x16xbf16>, vector<32x16xf32> -> vector<32x16xf32>
    %233 = vector.extract_strided_slice %232 {offsets = [0, 0], sizes = [16, 16], strides = [1, 1]} : vector<32x16xf32> to vector<16x16xf32>
    %234 = vector.extract_strided_slice %232 {offsets = [16, 0], sizes = [16, 16], strides = [1, 1]} : vector<32x16xf32> to vector<16x16xf32>
    %235 = tpu.concatenate %233, %234 in 1 : vector<16x16xf32>, vector<16x16xf32> -> vector<16x32xf32>
    %236 = arith.truncf %235 : vector<16x32xf32> to vector<16x32xbf16>
    %c1_65 = arith.constant 1 : index
    %c0_66 = arith.constant 0 : index
    %c0_67 = arith.constant 0 : index
    %237 = vector.load %arg5[%c1_65, %c0_66, %c0_67] : memref<2x32x32xbf16, #tpu.memory_space<vmem>>, vector<1x32x32xbf16>
    %238 = vector.shape_cast %237 : vector<1x32x32xbf16> to vector<32x32xbf16>
    %cst_68 = arith.constant dense<0.000000e+00> : vector<16x32xf32>
    %239 = tpu.matmul %236, %238, %cst_68 {dimension_numbers = #tpu.dot_dimension_numbers<[1], [0], [0], [1], [0, 0, 1, 1], [], []>} : vector<16x32xbf16>, vector<32x32xbf16>, vector<16x32xf32> -> vector<16x32xf32>
    %240 = vector.broadcast %189 : vector<1x32xf32> to vector<16x32xf32>
    %241 = arith.addf %239, %240 : vector<16x32xf32>
    %242 = arith.addf %185, %241 : vector<16x32xf32>
    %cst_69 = arith.constant dense<0.000000e+00> : vector<16xf32>
    %243 = vector.multi_reduction <add>, %242, %cst_69 [1] : vector<16x32xf32> to vector<16xf32>
    %244 = vector.shape_cast %243 : vector<16xf32> to vector<16x1xf32>
    %cst_70 = arith.constant 3.200000e+01 : f32
    %245 = vector.broadcast %cst_70 : f32 to vector<16x1xf32>
    %246 = arith.divf %244, %245 : vector<16x1xf32>
    %247 = vector.broadcast %246 : vector<16x1xf32> to vector<16x32xf32>
    %248 = arith.subf %242, %247 : vector<16x32xf32>
    %249 = arith.mulf %248, %248 : vector<16x32xf32>
    %cst_71 = arith.constant dense<0.000000e+00> : vector<16xf32>
    %250 = vector.multi_reduction <add>, %249, %cst_71 [1] : vector<16x32xf32> to vector<16xf32>
    %251 = vector.shape_cast %250 : vector<16xf32> to vector<16x1xf32>
    %cst_72 = arith.constant 3.200000e+01 : f32
    %252 = vector.broadcast %cst_72 : f32 to vector<16x1xf32>
    %253 = arith.divf %251, %252 : vector<16x1xf32>
    %cst_73 = arith.constant 9.99999996E-13 : f32
    %254 = vector.broadcast %cst_73 : f32 to vector<16x1xf32>
    %255 = arith.addf %253, %254 : vector<16x1xf32>
    %256 = math.rsqrt %255 : vector<16x1xf32>
    %257 = vector.broadcast %256 : vector<16x1xf32> to vector<16x32xf32>
    %258 = arith.mulf %248, %257 : vector<16x32xf32>
    %259 = vector.broadcast %190 : vector<1x32xf32> to vector<16x32xf32>
    %260 = arith.mulf %258, %259 : vector<16x32xf32>
    %261 = vector.broadcast %191 : vector<1x32xf32> to vector<16x32xf32>
    %262 = arith.addf %260, %261 : vector<16x32xf32>
    %263 = arith.truncf %262 : vector<16x32xf32> to vector<16x32xbf16>
    %c1_74 = arith.constant 1 : index
    %c0_75 = arith.constant 0 : index
    %c0_76 = arith.constant 0 : index
    %264 = vector.load %arg6[%c1_74, %c0_75, %c0_76] : memref<2x32x64xbf16, #tpu.memory_space<vmem>>, vector<1x32x64xbf16>
    %265 = vector.shape_cast %264 : vector<1x32x64xbf16> to vector<32x64xbf16>
    %cst_77 = arith.constant dense<0.000000e+00> : vector<16x64xf32>
    %266 = tpu.matmul %263, %265, %cst_77 {dimension_numbers = #tpu.dot_dimension_numbers<[1], [0], [0], [1], [0, 0, 1, 1], [], []>} : vector<16x32xbf16>, vector<32x64xbf16>, vector<16x64xf32> -> vector<16x64xf32>
    %267 = vector.broadcast %192 : vector<1x64xf32> to vector<16x64xf32>
    %268 = arith.addf %266, %267 : vector<16x64xf32>
    %cst_78 = arith.constant 5.000000e-01 : f32
    %269 = vector.broadcast %cst_78 : f32 to vector<16x64xf32>
    %270 = arith.mulf %269, %268 : vector<16x64xf32>
    %cst_79 = arith.constant 4.471500e-02 : f32
    %271 = vector.broadcast %cst_79 : f32 to vector<16x64xf32>
    %272 = arith.mulf %271, %268 : vector<16x64xf32>
    %273 = arith.mulf %272, %268 : vector<16x64xf32>
    %274 = arith.mulf %273, %268 : vector<16x64xf32>
    %275 = arith.addf %268, %274 : vector<16x64xf32>
    %cst_80 = arith.constant 0.797884583 : f32
    %276 = vector.broadcast %cst_80 : f32 to vector<16x64xf32>
    %277 = arith.mulf %276, %275 : vector<16x64xf32>
    %278 = math.tanh %277 : vector<16x64xf32>
    %cst_81 = arith.constant 1.000000e+00 : f32
    %279 = vector.broadcast %cst_81 : f32 to vector<16x64xf32>
    %280 = arith.addf %279, %278 : vector<16x64xf32>
    %281 = arith.mulf %270, %280 : vector<16x64xf32>
    %282 = arith.truncf %281 : vector<16x64xf32> to vector<16x64xbf16>
    %c1_82 = arith.constant 1 : index
    %c0_83 = arith.constant 0 : index
    %c0_84 = arith.constant 0 : index
    %283 = vector.load %arg7[%c1_82, %c0_83, %c0_84] : memref<2x64x32xbf16, #tpu.memory_space<vmem>>, vector<1x64x32xbf16>
    %284 = vector.shape_cast %283 : vector<1x64x32xbf16> to vector<64x32xbf16>
    %cst_85 = arith.constant dense<0.000000e+00> : vector<16x32xf32>
    %285 = tpu.matmul %282, %284, %cst_85 {dimension_numbers = #tpu.dot_dimension_numbers<[1], [0], [0], [1], [0, 0, 1, 1], [], []>} : vector<16x64xbf16>, vector<64x32xbf16>, vector<16x32xf32> -> vector<16x32xf32>
    %286 = vector.broadcast %193 : vector<1x32xf32> to vector<16x32xf32>
    %287 = arith.addf %285, %286 : vector<16x32xf32>
    %288 = arith.addf %262, %287 : vector<16x32xf32>
    %cst_86 = arith.constant dense<0.000000e+00> : vector<16xf32>
    %289 = vector.multi_reduction <add>, %288, %cst_86 [1] : vector<16x32xf32> to vector<16xf32>
    %290 = vector.shape_cast %289 : vector<16xf32> to vector<16x1xf32>
    %cst_87 = arith.constant 3.200000e+01 : f32
    %291 = vector.broadcast %cst_87 : f32 to vector<16x1xf32>
    %292 = arith.divf %290, %291 : vector<16x1xf32>
    %293 = vector.broadcast %292 : vector<16x1xf32> to vector<16x32xf32>
    %294 = arith.subf %288, %293 : vector<16x32xf32>
    %295 = arith.mulf %294, %294 : vector<16x32xf32>
    %cst_88 = arith.constant dense<0.000000e+00> : vector<16xf32>
    %296 = vector.multi_reduction <add>, %295, %cst_88 [1] : vector<16x32xf32> to vector<16xf32>
    %297 = vector.shape_cast %296 : vector<16xf32> to vector<16x1xf32>
    %cst_89 = arith.constant 3.200000e+01 : f32
    %298 = vector.broadcast %cst_89 : f32 to vector<16x1xf32>
    %299 = arith.divf %297, %298 : vector<16x1xf32>
    %cst_90 = arith.constant 9.99999996E-13 : f32
    %300 = vector.broadcast %cst_90 : f32 to vector<16x1xf32>
    %301 = arith.addf %299, %300 : vector<16x1xf32>
    %302 = math.rsqrt %301 : vector<16x1xf32>
    %303 = vector.broadcast %302 : vector<16x1xf32> to vector<16x32xf32>
    %304 = arith.mulf %294, %303 : vector<16x32xf32>
    %305 = vector.broadcast %194 : vector<1x32xf32> to vector<16x32xf32>
    %306 = arith.mulf %304, %305 : vector<16x32xf32>
    %307 = vector.broadcast %195 : vector<1x32xf32> to vector<16x32xf32>
    %308 = arith.addf %306, %307 : vector<16x32xf32>
    %c0_91 = arith.constant 0 : index
    %c0_92 = arith.constant 0 : index
    %309 = vector.load %arg9[%c0_91, %c0_92] : memref<16x32xf32, #tpu.memory_space<vmem>>, vector<16x32xf32>
    tpu.vector_store %arg9[%c0_91, %c0_92], %308 {strides = array<i32>} : memref<16x32xf32, #tpu.memory_space<vmem>>, vector<16x32xf32>,
    return
  }
}

</mosaic_0001>

<bundles_post_ra>
// kernel: textnet_forward.1
= control target key start
LH: loop header
LB: loop body
LE: loop exit
PB: predicated region body
PF: predicated region fallthrough
CT: control target
= control target key end

     0   :  { %v1863_v2 = vmov 0   ;;  %v1864_v15 = vmov 1   ;;  %s2313_s0 = inlined_call_operand.vmem [shape: s32[16,2], index: 0, kind: input, shape index: {}]   ;;  %s2314_s1 = inlined_call_operand.vmem [shape: f32[1,16], index: 1, kind: input, shape index: {}]   ;;  %s2315_s2 = inlined_call_operand.vmem [shape: f32[128,32], index: 2, kind: input, shape index: {}]   ;;  %s2316_s3 = inlined_call_operand.vmem [shape: f32[12,32], index: 3, kind: input, shape index: {}]   ;;  %s2317_s4 = inlined_call_operand.vmem [shape: bf16[2,32,96], index: 4, kind: input, shape index: {}]   ;;  %s2318_s5 = inlined_call_operand.vmem [shape: bf16[2,32,32], index: 5, kind: input, shape index: {}]   ;;  %s2319_s6 = inlined_call_operand.vmem [shape: bf16[2,32,64], index: 6, kind: input, shape index: {}]   ;;  %s2320_s7 = inlined_call_operand.vmem [shape: bf16[2,64,32], index: 7, kind: input, shape index: {}]   ;;  %s2321_s8 = inlined_call_operand.vmem [shape: f32[2,8,96], index: 8, kind: input, shape index: {}]   ;;  %s2322_s9 = inlined_call_operand.hbm [shape: f32[16,32], index: 9, kind: output, shape index: {}]  }
   0x1   :  { %v34_v0 = vld [vmem:[%s2313_s0] sm:$0xff]  ;;  %1736 = vset.pattern.permute.xlu0 %v1863_v2  ;;  %v53_v3 = vld [vmem:[%s2315_s2 + $0x8] sm:$0xff]  ;;  %v54_v4 = vld [vmem:[%s2315_s2 + $0x10] sm:$0xff]  ;;  %1737 = vset.pattern.permute.xlu1 %v1864_v15 }
   0x2   :  { %v52_v1 = vld [vmem:[%s2315_s2] sm:$0xff]  ;;  %v55_v5 = vld [vmem:[%s2315_s2 + $0x18] sm:$0xff]  ;;  %41 = vperm.xlu0 %1736, %v34_v0   ;;  %v35_v8 = vld [vmem:[%s2313_s0 + $0x8] sm:$0xff]  ;;  %v36_v14 = vcvt.s32.f32 %v34_v0 }
   0x3   :  { %v1688_v6 = vpack.c.bf16 %v53_v3, %v52_v1  ;;  %v1692_v7 = vpack.c.bf16 %v55_v5, %v54_v4  ;;  %v56_v9 = vld [vmem:[%s2315_s2 + $0x20] sm:$0xff]  ;;  %v57_v10 = vld [vmem:[%s2315_s2 + $0x28] sm:$0xff]  ;;  %v58_v12 = vld [vmem:[%s2315_s2 + $0x30] sm:$0xff]  ;;  %v37_v16 = vcvt.s32.f32 %v35_v8 }
   0x4   :  { %v1696_v11 = vpack.c.bf16 %v57_v10, %v56_v9  ;;  %v59_v13 = vld [vmem:[%s2315_s2 + $0x38] sm:$0xff]  ;;  %v60_v17 = vld [vmem:[%s2315_s2 + $0x40] sm:$0xff]  ;;  %v61_v18 = vld [vmem:[%s2315_s2 + $0x48] sm:$0xff]  ;;  %76 = vperm.xlu1 %1737, %v36_v14  }
   0x5   :  { %1689 = vmatprep.subr.bf16.mxu0 %v1688_v6  ;;  %v1700_v19 = vpack.c.bf16 %v59_v13, %v58_v12  ;;  %v62_v20 = vld [vmem:[%s2315_s2 + $0x50] sm:$0xff]  ;;  %v63_v21 = vld [vmem:[%s2315_s2 + $0x58] sm:$0xff]  ;;  %v1704_v22 = vpack.c.bf16 %v61_v18, %v60_v17  ;;  %v64_v23 = vld [vmem:[%s2315_s2 + $0x60] sm:$0xff] }
   0x6   :  { %1691 = vmatpush3.bf16.msra.mxu0 %v1688_v6  ;;  %44 = vperm.xlu0 %1736, %v35_v8   ;;  %v65_v24 = vld [vmem:[%s2315_s2 + $0x68] sm:$0xff]  ;;  %v1708_v25 = vpack.c.bf16 %v63_v21, %v62_v20 }
   0x7   :  { %1693 = vmatprep.subr.bf16.mxu0 %v1692_v7 }
   0x8   :  { %81 = vperm.xlu1 %1737, %v37_v16  }
   0xa   :  { %1695 = vmatpush3.bf16.msra.mxu0 %v1692_v7  ;;  %1758 = vset.pattern.permute.xlu0 %v1864_v15 }
   0xb   :  { %1697 = vmatprep.subr.bf16.mxu0 %v1696_v11 }
   0xe   :  { %1699 = vmatpush3.bf16.msra.mxu0 %v1696_v11 }
   0xf   :  { %1701 = vmatprep.subr.bf16.mxu0 %v1700_v19 }
  0x12   :  { %1703 = vmatpush3.bf16.msra.mxu0 %v1700_v19 }
  0x13   :  { %1705 = vmatprep.subr.bf16.mxu0 %v1704_v22 }
  0x14   :  { %14 = vsyncpa [#allocation3], 0  ;;  %v1712_v26 = vpack.c.bf16 %v65_v24, %v64_v23  ;;  %v66_v27 = vld [vmem:[%s2315_s2 + $0x70] sm:$0xff]  ;;  %v67_v28 = vld [vmem:[%s2315_s2 + $0x78] sm:$0xff]  ;;  %v38_v30 = vlaneseq  ;;  %v1865_v33 = vmov 1.0   ;;  %vm173_vm2 = vcmask 261120  }
  0x15   :  { %v1716_v29 = vpack.c.bf16 %v67_v28, %v66_v27  ;;  %v1986_v35 = vld [vmem:[%s2316_s3 + $0x8] sm:$0xf]  ;;  %v68_v47 = vld [vmem:[%s2316_s3] sm:$0xff]  ;;  %v1866_v5 = vmov 0.0   ;;  %vm1867_vm3 = vmmov 0   ;;  %vm238_vm4 = vcmask 130048  }
  0x16   :  { %1707 = vmatpush3.bf16.msra.mxu0 %v1704_v22  ;;  %v1979_v31 = vand.u32 127, %v38_v30  ;;  %v1988_v36 = vshrl.u32 %v38_v30, 7  ;;  %v71_v37 = vrot.slane %v1986_v35, 7  ;;  %v1759_v4 = vld [vmem:[%s2317_s4] sm:$0xff]   ;;  %1584 = vmatprep.subr.bf16.mxu1 %v1866_v5  ;;  %v1760_v6 = vld [vmem:[%s2317_s4 + $0x8] sm:$0xff]   ;;  %s1868_s30 = smov 112  }
  0x17   :  { %1709 = vmatprep.subr.bf16.mxu0 %v1708_v25  ;;  %1585 = vmatpush3.bf16.msra.mxu1 %v1759_v4  ;;  %s1869_s10 = smov 96   ;;  %s1870_s13 = smov 16   ;;  %vm741_vm9 = vcmask 523264  }
  0x18   :  { %v73_v39 = vsub.f32 %v1986_v35, %v71_v37  ;;  %v1993_v40 = vsub.s32 1, %v1988_v36  ;;  %v1997_v42 = vsub.s32 0, %v1988_v36  ;;  %1588 = vmatprep.mubr.msk.bf16.mxu1 %vm1867_vm3, %v1866_v5  ;;  %1586 = vmatprep.subr.bf16.mxu1 %v1866_v5  ;;  %v2022_v13 = vsub.s32 2, %v1988_v36 }
  0x19   :  { %v2027_v17 = vsub.s32 3, %v1988_v36 }
  0x1a   :  { %1711 = vmatpush3.bf16.msra.mxu0 %v1708_v25  ;;  %v87_v41 = vrot.slane %v73_v39, %v1993_v40  ;;  %v93_v44 = vrot.slane %v1986_v35, %v1997_v42  ;;  %v204_v16 = vrot.slane %v1986_v35, %v2022_v13 }
  0x1b   :  { %1713 = vmatprep.subr.bf16.mxu0 %v1712_v26  ;;  %1587 = vmatpush3.bf16.msra.mxu1 %v1760_v6  ;;  %v210_v21 = vrot.slane %v1986_v35, %v2027_v17 }
  0x1e   :  { %1715 = vmatpush3.bf16.msra.mxu0 %v1712_v26  ;;  %v2041_v26 = vld [vmem:[%s2321_s8] sm:$0xff] }
  0x1f   :  { %1717 = vmatprep.subr.bf16.mxu0 %v1716_v29  ;;  %v257_v27 = vrot.slane %v2041_v26, %v1997_v42 }
  0x22   :  { %1719 = vmatpush3.bf16.msra.mxu0 %v1716_v29 }
  0x23   :  { %1624 = vmatprep.subr.bf16.mxu0 %v1866_v5 }
  0x81   :  { %v42_v32 = vpop.permute.xlu0 %41 }
  0x82   :  { %vm46_vm0 = vcmp.eq.s32.totalorder %v1979_v31, %v42_v32 }
  0x83   :  { %1581 = vmatprep.mubr.msk.f32.mxu0 %vm46_vm0, %v1865_v33  ;;  %v77_v38 = vpop.permute.xlu1 %76 }
  0x84   :  { %v88_v46 = vmul.f32 %v87_v41, %v77_v38 }
  0x85   :  { %v45_v34 = vpop.permute.xlu0 %44 }
  0x86   :  { %vm47_vm1 = vcmp.eq.s32.totalorder %v1979_v31, %v45_v34  ;;  %v94_v49 = vadd.f32 %v93_v44, %v88_v46 }
  0x87   :  { %1582 = vmatmul.mubr.msk.f32.vlgmr.msra.gmra.mrb[0].mxu0 %vm47_vm1, %v1865_v33  ;;  %v82_v43 = vpop.permute.xlu1 %81 }
  0x88   :  { %v89_v45 = vmul.f32 %v87_v41, %v82_v43  ;;  %1632 = vmatprep.mubr.msk.bf16.mxu0 %vm1867_vm3, %v1866_v5  ;;  %v227_v41 = vld [vmem:[%s2314_s1] sm:$0x1]  ;;  %s1871_s1 = smov 64  }
  0x89   :  { %v228_v46 = vsub.f32 1.0, %v227_v41 }
  0x8a   :  { %v95_v48 = vadd.f32 %v93_v44, %v89_v45 }
 0x15a   :  { %v1583_v50 = vpop.f32.mrb[0].mxu0 }
 0x15b   :  { %v168_v51 = vadd.f32 %v1583_v50, %v68_v47  ;;  %v162_v52 = vpop.f32.mrb[1].mxu0 }
 0x15c   :  { %v163_v53 = vadd.f32 %v162_v52, %v68_v47 }
 0x15d   :  { %v172_v54 = vadd.f32 %v168_v51, %v95_v48  ;;  %v229_v48 = vmul.f32 -10000.0, %v228_v46 }
 0x15e   :  { %v171_v55 = vadd.f32 %v163_v53, %v94_v49  ;;  %v216_v53 = vadd.s32 16, %v1988_v36 }
 0x15f   :  { %v177_v56 = vsel %vm173_vm2, %v172_v54, 0.0  ;;  %v234_v49 = vrot.slane %v229_v48, %v1997_v42 }
 0x160   :  { %178 = vadd.xlane.f32.xlu1 %v177_v56  ;;  %v174_v57 = vsel %vm173_vm2, %v171_v55, 0.0  ;;  %v218_v56 = vshra.s32 %v1988_v36, 3 }
 0x161   :  { %175 = vadd.xlane.f32.xlu0 %v174_v57  ;;  %v215_v57 = vadd.s32 8, %v1988_v36 }
 0x1ed   :  { %v179_v58 = vpop.xlane.xlu1 %178 }
 0x1ee   :  { %v182_v59 = vmul.f32 0.03125, %v179_v58  ;;  %v176_v60 = vpop.xlane.xlu0 %175  ;;  %v220_v58 = vshra.s32 %v216_v53, 3 }
 0x1ef   :  { %v181_v61 = vmul.f32 0.03125, %v176_v60 }
 0x1f0   :  { %v184_v62 = vsub.f32 %v172_v54, %v182_v59  ;;  %v222_v54 = vshra.s32 %v1979_v31, 3  ;;  %v217_v59 = vadd.s32 24, %v1988_v36 }
 0x1f1   :  { %v183_v63 = vsub.f32 %v171_v55, %v181_v61  ;;  %v219_v61 = vshra.s32 %v215_v57, 3 }
 0x1f2   :  { %v186_v2 = vmul.f32 %v184_v62, %v184_v62  ;;  %vm223_vm5 = vcmp.eq.s32.totalorder %v218_v56, %v222_v54  ;;  %vm225_vm6 = vcmp.eq.s32.totalorder %v220_v58, %v222_v54 }
 0x1f3   :  { %v185_v0 = vmul.f32 %v183_v63, %v183_v63  ;;  %vm224_vm7 = vcmp.eq.s32.totalorder %v219_v61, %v222_v54 }
 0x1f4   :  { %v190_v3 = vsel %vm173_vm2, %v186_v2, 0.0 }
 0x1f5   :  { %v187_v1 = vsel %vm173_vm2, %v185_v0, 0.0 }
 0x1f6   :  { %188 = vadd.xlane.f32.xlu0 %v187_v1 }
 0x1fa   :  { %191 = vadd.xlane.f32.xlu0 %v190_v3 }
 0x283   :  { %v189_v7 = vpop.xlane.xlu0 %188 }
 0x284   :  { %v193_v8 = vmul.f32 0.03125, %v189_v7 }
 0x286   :  { %v195_v9 = vadd.f32 1e-12, %v193_v8 }
 0x287   :  { %v192_v10 = vpop.xlane.xlu0 %191 }
 0x288   :  { %1779 = vrsqrt.f32 %v195_v9  ;;  %v194_v11 = vmul.f32 0.03125, %v192_v10 }
 0x28a   :  { %v196_v12 = vadd.f32 1e-12, %v194_v11 }
 0x28c   :  { %1781 = vrsqrt.f32 %v196_v12 }
 0x292   :  { %v1780_v14 = vpop.eup %1779 }
 0x293   :  { %v199_v15 = vmul.f32 %v1780_v14, %v183_v63  ;;  %v221_v63 = vshra.s32 %v217_v59, 3 }
 0x295   :  { %v205_v20 = vmul.f32 %v204_v16, %v199_v15  ;;  %vm226_vm8 = vcmp.eq.s32.totalorder %v221_v63, %v222_v54 }
 0x296   :  { %v1782_v18 = vpop.eup %1781 }
 0x297   :  { %v200_v19 = vmul.f32 %v1782_v18, %v184_v62  ;;  %v2031_v23 = vadd.f32 %v210_v21, %v205_v20 }
 0x299   :  { %v206_v22 = vmul.f32 %v204_v16, %v200_v19 }
 0x29b   :  { %v2033_v24 = vadd.f32 %v210_v21, %v206_v22 }
 0x29d   :  { %v249_v25 = vpack.c.bf16 %v2033_v24, %v2031_v23 }
 0x29f   :  { %1589 = vmatmul.mubr.msk.bf16.vlgmr.msra.gmra.mrb[0].mxu1 %vm173_vm2, %v249_v25 }
 0x372   :  { %v307_v28 = vpop.f32.mrb[0].mxu1 }
 0x373   :  { %v1590_v29 = vpop.f32.mrb[1].mxu1  ;;  %v308_v32 = vadd.f32 %v307_v28, %v257_v27 }
 0x374   :  { %v310_v30 = vpop.f32.mrb[2].mxu1 }
 0x375   :  { %v311_v33 = vadd.f32 %v310_v30, %v257_v27  ;;  %v1591_v34 = vpop.f32.mrb[3].mxu1 }
 0x377   :  { %v1738_v35 = vpack.i.bf16 %v311_v33, %v308_v32  ;;  %v2045_v37 = vpack.c.bf16 %v311_v33, %v308_v32 }
 0x379   :  { %1739 = vrot.lane.b32.xlu1 %v1738_v35, %s1868_s30  ;;  %326 = vrot.lane.b32.xlu0 %v2045_v37, %s1869_s10 }
 0x37a   :  { %1596 = vmatprep.mubr.msk.bf16.mxu1 %vm238_vm4, %v2045_v37 }
 0x3eb   :  { %v1740_v38 = vpop.permute.xlu1 %1739  ;;  %v327_v39 = vpop.permute.xlu0 %326 }
 0x3ec   :  { %v1742_v43 = vunpack.i.h.bf16 %v1740_v38  ;;  %v1741_v44 = vunpack.i.l.bf16 %v1740_v38  ;;  %v337_v45 = vsel %vm238_vm4, %v327_v39, 0  ;;  %1720 = vmatprep.subr.msk.bf16.mxu1 %vm238_vm4, %v327_v39 }
 0x3ed   :  { %1593 = vmatpush3.bf16.xpose.msra.mxu1 %v337_v45 }
 0x3ee   :  { %v2057_v47 = vpack.c.bf16 %v1742_v43, %v1741_v44 }
 0x3f0   :  { %328 = vrot.lane.b32.xlu1 %v2057_v47, %s1869_s10 }
 0x3f4   :  { %235 = vrot.lane.b32.xlu1 %v234_v49, %s1870_s13 }
 0x462   :  { %v329_v50 = vpop.permute.xlu1 %328 }
 0x463   :  { %v340_v51 = vsel %vm238_vm4, %v329_v50, 0  ;;  %1721 = vmatprep.subr.msk.bf16.mxu1 %vm238_vm4, %v329_v50 }
 0x464   :  { %1595 = vmatpush3.bf16.xpose.msra.mxu1 %v340_v51 }
 0x466   :  { %v236_v52 = vpop.permute.xlu1 %235 }
 0x467   :  { %v239_v55 = vsel %vm238_vm4, %v229_v48, %v236_v52 }
 0x468   :  { %v243_v60 = vrot.slane %v239_v55, %v1997_v42 }
 0x46a   :  { %v2074_v1 = vsel %vm223_vm5, %v243_v60, -10000.0  ;;  %v2076_v6 = vsel %vm225_vm6, %v243_v60, -10000.0  ;;  %v2079_v9 = vsel %vm224_vm7, %v243_v60, -10000.0  ;;  %v2084_v15 = vsel %vm226_vm8, %v243_v60, -10000.0 }
 0x46b   :  { %1597 = vmatmul.mubr.msk.bf16.vlgmr.msra.gmra.mrb[4].mxu1 %vm238_vm4, %v2057_v47 }
 0x53e   :  { %v1598_v62 = vpop.f32.mrb[4].mxu1 }
 0x53f   :  { %v376_v0 = vpop.f32.mrb[5].mxu1  ;;  %v393_v31 = vmul.f32 0.25, %v1598_v62 }
 0x540   :  { %v391_v2 = vmul.f32 0.25, %v376_v0  ;;  %v1599_v3 = vpop.f32.mrb[6].mxu1  ;;  %v1761_v0 = vld [vmem:[%s2318_s5] sm:$0xff]  }
 0x541   :  { %v379_v4 = vpop.f32.mrb[7].mxu1  ;;  %v394_v10 = vmul.f32 0.25, %v1599_v3  ;;  %v397_v14 = vadd.f32 %v393_v31, %v2076_v6  ;;  %v1762_v31 = vld [vmem:[%s2318_s5 + $0x8] sm:$0xff]  }
 0x542   :  { %v392_v7 = vmul.f32 0.25, %v379_v4  ;;  %v395_v8 = vadd.f32 %v391_v2, %v2074_v1 }
 0x543   :  { %v405_v18 = vsel %vm173_vm2, %v397_v14, -inf  ;;  %v398_v19 = vadd.f32 %v394_v10, %v2084_v15 }
 0x544   :  { %v399_v11 = vsel %vm173_vm2, %v395_v8, -inf  ;;  %v396_v12 = vadd.f32 %v392_v7, %v2079_v9 }
 0x545   :  { %400 = vmax.xlane.f32.xlu0 %v399_v11  ;;  %v408_v20 = vsel %vm173_vm2, %v398_v19, -inf }
 0x546   :  { %v402_v16 = vsel %vm173_vm2, %v396_v12, -inf }
 0x547   :  { %403 = vmax.xlane.f32.xlu1 %v402_v16 }
 0x549   :  { %406 = vmax.xlane.f32.xlu0 %v405_v18 }
 0x54d   :  { %409 = vmax.xlane.f32.xlu0 %v408_v20 }
 0x5d2   :  { %v401_v21 = vpop.xlane.xlu0 %400 }
 0x5d3   :  { %v411_v22 = vsub.f32 %v395_v8, %v401_v21 }
 0x5d4   :  { %v404_v25 = vpop.xlane.xlu1 %403 }
 0x5d5   :  { %v415_v29 = vmul.f32 1.442695, %v411_v22  ;;  %v412_v30 = vsub.f32 %v396_v12, %v404_v25 }
 0x5d6   :  { %v407_v27 = vpop.xlane.xlu0 %406 }
 0x5d7   :  { %v413_v28 = vsub.f32 %v397_v14, %v407_v27  ;;  %v417_v35 = vmul.f32 1.442695, %v412_v30 }
 0x5d9   :  { %v419_v32 = vmul.f32 1.442695, %v413_v28 }
 0x5da   :  { %v410_v33 = vpop.xlane.xlu0 %409 }
 0x5db   :  { %1783 = vpow2.f32 %v419_v32  ;;  %v414_v34 = vsub.f32 %v398_v19, %v410_v33  ;;  %v524_v19 = vrot.slane %v2041_v26, %v1993_v40 }
 0x5dc   :  { %1785 = vpow2.f32 %v415_v29 }
 0x5dd   :  { %v421_v38 = vmul.f32 1.442695, %v414_v34 }
 0x5df   :  { %1787 = vpow2.f32 %v421_v38 }
 0x5e0   :  { %1789 = vpow2.f32 %v417_v35 }
 0x5e5   :  { %v1784_v39 = vpop.eup %1783 }
 0x5e6   :  { %v429_v41 = vsel %vm173_vm2, %v1784_v39, 0.0  ;;  %v1786_v43 = vpop.eup %1785 }
 0x5e7   :  { %430 = vadd.xlane.f32.xlu1 %v429_v41  ;;  %v423_v46 = vsel %vm173_vm2, %v1786_v43, 0.0 }
 0x5e9   :  { %v1788_v44 = vpop.eup %1787 }
 0x5ea   :  { %v432_v45 = vsel %vm173_vm2, %v1788_v44, 0.0  ;;  %v1790_v48 = vpop.eup %1789 }
 0x5eb   :  { %433 = vadd.xlane.f32.xlu0 %v432_v45  ;;  %424 = vadd.xlane.f32.xlu1 %v423_v46  ;;  %v426_v49 = vsel %vm173_vm2, %v1790_v48, 0.0 }
 0x5ef   :  { %427 = vadd.xlane.f32.xlu0 %v426_v49 }
 0x5fc   :  { %445 = vrot.lane.b32.xlu1 %v2045_v37, %s1871_s1 }
 0x605   :  { %447 = vrot.lane.b32.xlu0 %v2057_v47, %s1871_s1 }
 0x674   :  { %v431_v50 = vpop.xlane.xlu1 %430 }
 0x678   :  { %v434_v51 = vpop.xlane.xlu0 %433  ;;  %v425_v52 = vpop.xlane.xlu1 %424 }
 0x679   :  { %1791 = vrcp.f32 %v434_v51 }
 0x67a   :  { %1793 = vrcp.f32 %v425_v52 }
 0x67b   :  { %1795 = vrcp.f32 %v431_v50 }
 0x67c   :  { %v428_v53 = vpop.xlane.xlu0 %427  ;;  %v446_v54 = vpop.permute.xlu1 %445 }
 0x67d   :  { %1797 = vrcp.f32 %v428_v53  ;;  %1600 = vmatprep.subr.bf16.mxu1 %v446_v54 }
 0x67e   :  { %1601 = vmatpush3.bf16.msra.mxu1 %v446_v54 }
 0x680   :  { %v448_v55 = vpop.permute.xlu0 %447 }
 0x681   :  { %1602 = vmatprep.subr.bf16.mxu1 %v448_v55 }
 0x682   :  { %1603 = vmatpush3.bf16.msra.mxu1 %v448_v55  ;;  %v612_v55 = vrot.slane %v2041_v26, %v2022_v13 }
 0x683   :  { %1608 = vmatprep.subr.bf16.mxu1 %v1866_v5  ;;  %v1792_v37 = vpop.eup %1791 }
 0x684   :  { %v1794_v56 = vpop.eup %1793  ;;  %v442_v58 = vmul.f32 %v1792_v37, %v1788_v44 }
 0x685   :  { %v1796_v57 = vpop.eup %1795  ;;  %v439_v59 = vmul.f32 %v1794_v56, %v1786_v43 }
 0x686   :  { %v441_v61 = vmul.f32 %v1796_v57, %v1784_v39 }
 0x687   :  { %v1798_v47 = vpop.eup %1797 }
 0x688   :  { %v440_v60 = vmul.f32 %v1798_v47, %v1790_v48  ;;  %v444_v63 = vpack.c.bf16 %v442_v58, %v441_v61  ;;  %v1764_v48 = vld [vmem:[%s2319_s6 + $0x8] sm:$0xff]  }
 0x68a   :  { %v443_v62 = vpack.c.bf16 %v440_v60, %v439_v59  ;;  %v618_v59 = vrot.slane %v2041_v26, %v2027_v17 }
 0x68c   :  { %1604 = vmatprep.mubr.msk.bf16.mxu1 %vm173_vm2, %v443_v62 }
 0x68d   :  { %1605 = vmatmul.mubr.msk.bf16.vlgmr.msra.gmra.mrb[8].mxu1 %vm173_vm2, %v444_v63 }
 0x68e   :  { %1612 = vmatprep.mubr.msk.bf16.mxu1 %vm1867_vm3, %v1866_v5  ;;  %1609 = vmatpush3.bf16.msra.mxu1 %v1761_v0  ;;  %v1765_v0 = vld [vmem:[%s2320_s7] sm:$0xff]  }
 0x68f   :  { %1610 = vmatprep.subr.bf16.mxu1 %v1866_v5  ;;  %1625 = vmatpush3.bf16.msra.mxu0 %v1765_v0 }
 0x690   :  { %1626 = vmatprep.subr.bf16.mxu0 %v1866_v5 }
 0x692   :  { %1611 = vmatpush3.bf16.msra.mxu1 %v1762_v31  ;;  %v1766_v31 = vld [vmem:[%s2320_s7 + $0x8] sm:$0xff]  }
 0x693   :  { %1616 = vmatprep.subr.bf16.mxu1 %v1866_v5  ;;  %1627 = vmatpush3.bf16.msra.mxu0 %v1766_v31  ;;  %v1770_v31 = vld [vmem:[%s2317_s4 + $0x18] sm:$0xff]  }
 0x694   :  { %1628 = vmatprep.subr.bf16.mxu0 %v1866_v5 }
 0x760   :  { %v1606_v2 = vpop.f32.mrb[8].mxu1 }
 0x761   :  { %v491_v3 = vpop.f32.mrb[9].mxu1 }
 0x762   :  { %v1607_v4 = vpop.f32.mrb[10].mxu1 }
 0x763   :  { %v1743_v7 = vpack.i.bf16 %v1607_v4, %v1606_v2  ;;  %v494_v8 = vpop.f32.mrb[11].mxu1  ;;  %v1767_v2 = vld [vmem:[%s2320_s7 + $0x10] sm:$0xff]   ;;  %v628_v4 = vsub.s32 4, %v1988_v36 }
 0x764   :  { %1629 = vmatpush3.bf16.msra.mxu0 %v1767_v2 }
 0x765   :  { %1744 = vrot.lane.b32.xlu1 %v1743_v7, %s1870_s13  ;;  %1630 = vmatprep.subr.bf16.mxu0 %v1866_v5  ;;  %v629_v7 = vrot.slane %v2041_v26, %v628_v4 }
 0x7d7   :  { %v1745_v10 = vpop.permute.xlu1 %1744 }
 0x7d8   :  { %v1747_v11 = vunpack.i.h.bf16 %v1745_v10  ;;  %v1746_v12 = vunpack.i.l.bf16 %v1745_v10 }
 0x7da   :  { %v514_v14 = vsel %vm238_vm4, %v491_v3, %v1746_v12  ;;  %v515_v16 = vsel %vm238_vm4, %v494_v8, %v1747_v11  ;;  %v1768_v3 = vld [vmem:[%s2320_s7 + $0x18] sm:$0xff]  }
 0x7db   :  { %v516_v18 = vpack.c.bf16 %v515_v16, %v514_v14  ;;  %1631 = vmatpush3.bf16.msra.mxu0 %v1768_v3 }
 0x7dd   :  { %1613 = vmatmul.mubr.msk.bf16.vlgmr.msra.gmra.mrb[12].mxu1 %vm173_vm2, %v516_v18 }
 0x7de   :  { %1620 = vmatprep.mubr.msk.bf16.mxu1 %vm1867_vm3, %v1866_v5 }
 0x8b0   :  { %v574_v20 = vpop.f32.mrb[12].mxu1 }
 0x8b1   :  { %v575_v21 = vadd.f32 %v574_v20, %v524_v19  ;;  %v1614_v22 = vpop.f32.mrb[13].mxu1 }
 0x8b2   :  { %v577_v25 = vpop.f32.mrb[14].mxu1 }
 0x8b3   :  { %v578_v27 = vadd.f32 %v577_v25, %v524_v19  ;;  %v1615_v28 = vpop.f32.mrb[15].mxu1  ;;  %v581_v29 = vadd.f32 %v575_v21, %v2031_v23 }
 0x8b5   :  { %v583_v30 = vsel %vm173_vm2, %v581_v29, 0.0  ;;  %v582_v32 = vadd.f32 %v578_v27, %v2033_v24  ;;  %v1763_v24 = vld [vmem:[%s2319_s6] sm:$0xff]  }
 0x8b6   :  { %584 = vadd.xlane.f32.xlu1 %v583_v30  ;;  %1617 = vmatpush3.bf16.msra.mxu1 %v1763_v24 }
 0x8b7   :  { %v586_v33 = vsel %vm173_vm2, %v582_v32, 0.0  ;;  %1618 = vmatprep.subr.bf16.mxu1 %v1866_v5 }
 0x8b8   :  { %587 = vadd.xlane.f32.xlu0 %v586_v33 }
 0x8ba   :  { %1619 = vmatpush3.bf16.msra.mxu1 %v1764_v48 }
 0x8bb   :  { %1636 = vmatprep.subr.bf16.mxu1 %v1866_v5 }
 0x943   :  { %v585_v34 = vpop.xlane.xlu1 %584 }
 0x944   :  { %v589_v35 = vmul.f32 0.03125, %v585_v34 }
 0x945   :  { %v588_v38 = vpop.xlane.xlu0 %587 }
 0x946   :  { %v591_v39 = vsub.f32 %v581_v29, %v589_v35  ;;  %v590_v41 = vmul.f32 0.03125, %v588_v38 }
 0x948   :  { %v592_v43 = vsub.f32 %v582_v32, %v590_v41  ;;  %v593_v44 = vmul.f32 %v591_v39, %v591_v39 }
 0x94a   :  { %v595_v45 = vsel %vm173_vm2, %v593_v44, 0.0  ;;  %v594_v46 = vmul.f32 %v592_v43, %v592_v43 }
 0x94b   :  { %596 = vadd.xlane.f32.xlu0 %v595_v45  ;;  %v715_v45 = vsub.s32 5, %v1988_v36 }
 0x94c   :  { %v598_v23 = vsel %vm173_vm2, %v594_v46, 0.0 }
 0x94d   :  { %599 = vadd.xlane.f32.xlu1 %v598_v23  ;;  %v716_v46 = vrot.slane %v2041_v26, %v715_v45 }
 0x9d8   :  { %v597_v49 = vpop.xlane.xlu0 %596 }
 0x9d9   :  { %v601_v50 = vmul.f32 0.03125, %v597_v49 }
 0x9da   :  { %v600_v51 = vpop.xlane.xlu1 %599 }
 0x9db   :  { %v603_v52 = vadd.f32 1e-12, %v601_v50  ;;  %v602_v53 = vmul.f32 0.03125, %v600_v51 }
 0x9dd   :  { %1799 = vrsqrt.f32 %v603_v52  ;;  %v604_v54 = vadd.f32 1e-12, %v602_v53 }
 0x9df   :  { %1801 = vrsqrt.f32 %v604_v54 }
 0x9e7   :  { %v1800_v37 = vpop.eup %1799 }
 0x9e8   :  { %v607_v56 = vmul.f32 %v1800_v37, %v591_v39 }
 0x9e9   :  { %v1802_v57 = vpop.eup %1801 }
 0x9ea   :  { %v613_v47 = vmul.f32 %v612_v55, %v607_v56  ;;  %v608_v58 = vmul.f32 %v1802_v57, %v592_v43 }
 0x9ec   :  { %v614_v60 = vmul.f32 %v612_v55, %v608_v58  ;;  %v619_v61 = vadd.f32 %v618_v59, %v613_v47 }
 0x9ee   :  { %v620_v62 = vadd.f32 %v618_v59, %v614_v60 }
 0x9f0   :  { %v621_v63 = vpack.c.bf16 %v620_v62, %v619_v61 }
 0x9f2   :  { %1621 = vmatmul.mubr.msk.bf16.vlgmr.msra.gmra.mrb[16].mxu1 %vm173_vm2, %v621_v63 }
 0x9f3   :  { %1640 = vmatprep.mubr.msk.bf16.mxu1 %vm1867_vm3, %v1866_v5 }
 0xac5   :  { %v679_v8 = vpop.f32.mrb[16].mxu1 }
 0xac6   :  { %v680_v10 = vadd.f32 %v679_v8, %v629_v7  ;;  %v1622_v11 = vpop.f32.mrb[17].mxu1 }
 0xac7   :  { %v682_v12 = vpop.f32.mrb[18].mxu1 }
 0xac8   :  { %v688_v14 = vmul.f32 0.044715, %v680_v10  ;;  %v683_v16 = vadd.f32 %v682_v12, %v629_v7  ;;  %v1623_v18 = vpop.f32.mrb[19].mxu1  ;;  %v686_v35 = vmul.f32 0.5, %v680_v10  ;;  %v816_v12 = vsub.s32 6, %v1988_v36 }
 0xaca   :  { %v690_v19 = vmul.f32 %v688_v14, %v680_v10  ;;  %v689_v20 = vmul.f32 0.044715, %v683_v16  ;;  %v687_v38 = vmul.f32 0.5, %v683_v16  ;;  %v817_v14 = vrot.slane %v2041_v26, %v816_v12 }
 0xacc   :  { %v692_v21 = vmul.f32 %v690_v19, %v680_v10  ;;  %v691_v22 = vmul.f32 %v689_v20, %v683_v16 }
 0xace   :  { %v694_v25 = vadd.f32 %v692_v21, %v680_v10  ;;  %v693_v27 = vmul.f32 %v691_v22, %v683_v16 }
 0xad0   :  { %v696_v28 = vmul.f32 0.7978846, %v694_v25  ;;  %v695_v29 = vadd.f32 %v693_v27, %v683_v16  ;;  %v822_v16 = vsub.s32 7, %v1988_v36 }
 0xad2   :  { %1803 = vtanh.f32 %v696_v28  ;;  %v697_v30 = vmul.f32 0.7978846, %v695_v29  ;;  %v823_v25 = vrot.slane %v2041_v26, %v822_v16 }
 0xad4   :  { %1805 = vtanh.f32 %v697_v30 }
 0xadc   :  { %v1804_v32 = vpop.eup %1803 }
 0xadd   :  { %v700_v33 = vadd.f32 1.0, %v1804_v32  ;;  %v2193_v32 = vld [vmem:[%s2321_s8 + $0x8] sm:$0xff] }
 0xade   :  { %v1806_v34 = vpop.eup %1805 }
 0xadf   :  { %v701_v39 = vadd.f32 1.0, %v1806_v34  ;;  %v702_v41 = vmul.f32 %v700_v33, %v686_v35  ;;  %v837_v33 = vrot.slane %v2193_v32, %v1997_v42 }
 0xae1   :  { %v703_v43 = vmul.f32 %v701_v39, %v687_v38 }
 0xae3   :  { %v704_v44 = vpack.c.bf16 %v703_v43, %v702_v41 }
 0xae5   :  { %1633 = vmatmul.mubr.msk.bf16.vlgmr.msra.gmra.mrb[4].mxu0 %vm741_vm9, %v704_v44 }
 0xbb8   :  { %v779_v23 = vpop.f32.mrb[4].mxu0 }
 0xbb9   :  { %v780_v24 = vadd.f32 %v779_v23, %v716_v46  ;;  %v1634_v48 = vpop.f32.mrb[5].mxu0 }
 0xbba   :  { %v782_v49 = vpop.f32.mrb[6].mxu0 }
 0xbbb   :  { %v783_v50 = vadd.f32 %v782_v49, %v716_v46  ;;  %v1635_v51 = vpop.f32.mrb[7].mxu0  ;;  %v786_v52 = vadd.f32 %v780_v24, %v619_v61 }
 0xbbd   :  { %v788_v53 = vsel %vm173_vm2, %v786_v52, 0.0  ;;  %v787_v54 = vadd.f32 %v783_v50, %v620_v62  ;;  %v1769_v62 = vld [vmem:[%s2317_s4 + $0x10] sm:$0xff]  }
 0xbbe   :  { %789 = vadd.xlane.f32.xlu0 %v788_v53  ;;  %1637 = vmatpush3.bf16.msra.mxu1 %v1769_v62 }
 0xbbf   :  { %v791_v55 = vsel %vm173_vm2, %v787_v54, 0.0  ;;  %1638 = vmatprep.subr.bf16.mxu1 %v1866_v5 }
 0xbc0   :  { %792 = vadd.xlane.f32.xlu1 %v791_v55 }
 0xbc2   :  { %1639 = vmatpush3.bf16.msra.mxu1 %v1770_v31 }
 0xc4b   :  { %v790_v37 = vpop.xlane.xlu0 %789 }
 0xc4c   :  { %v794_v56 = vmul.f32 0.03125, %v790_v37 }
 0xc4d   :  { %v793_v57 = vpop.xlane.xlu1 %792 }
 0xc4e   :  { %v796_v47 = vsub.f32 %v786_v52, %v794_v56  ;;  %v795_v58 = vmul.f32 0.03125, %v793_v57 }
 0xc50   :  { %v797_v59 = vsub.f32 %v787_v54, %v795_v58  ;;  %v798_v60 = vmul.f32 %v796_v47, %v796_v47 }
 0xc52   :  { %v800_v63 = vsel %vm173_vm2, %v798_v60, 0.0  ;;  %v799_v0 = vmul.f32 %v797_v59, %v797_v59 }
 0xc53   :  { %801 = vadd.xlane.f32.xlu0 %v800_v63 }
 0xc54   :  { %v803_v61 = vsel %vm173_vm2, %v799_v0, 0.0 }
 0xc55   :  { %804 = vadd.xlane.f32.xlu1 %v803_v61 }
 0xce0   :  { %v802_v2 = vpop.xlane.xlu0 %801 }
 0xce1   :  { %v806_v3 = vmul.f32 0.03125, %v802_v2 }
 0xce2   :  { %v805_v7 = vpop.xlane.xlu1 %804 }
 0xce3   :  { %v808_v8 = vadd.f32 1e-12, %v806_v3  ;;  %v807_v10 = vmul.f32 0.03125, %v805_v7 }
 0xce5   :  { %1807 = vrsqrt.f32 %v808_v8  ;;  %v809_v11 = vadd.f32 1e-12, %v807_v10 }
 0xce7   :  { %1809 = vrsqrt.f32 %v809_v11 }
 0xcef   :  { %v1808_v18 = vpop.eup %1807 }
 0xcf0   :  { %v812_v19 = vmul.f32 %v1808_v18, %v796_v47 }
 0xcf1   :  { %v1810_v20 = vpop.eup %1809 }
 0xcf2   :  { %v818_v21 = vmul.f32 %v817_v14, %v812_v19  ;;  %v813_v22 = vmul.f32 %v1810_v20, %v797_v59 }
 0xcf4   :  { %v819_v27 = vmul.f32 %v817_v14, %v813_v22  ;;  %v2183_v28 = vadd.f32 %v823_v25, %v818_v21 }
 0xcf6   :  { %v2185_v29 = vadd.f32 %v823_v25, %v819_v27 }
 0xcf8   :  { %v828_v30 = vpack.c.bf16 %v2185_v29, %v2183_v28 }
 0xcfa   :  { %1641 = vmatmul.mubr.msk.bf16.vlgmr.msra.gmra.mrb[20].mxu1 %vm173_vm2, %v828_v30 }
 0xdcd   :  { %v887_v34 = vpop.f32.mrb[20].mxu1 }
 0xdce   :  { %v1642_v26 = vpop.f32.mrb[21].mxu1  ;;  %v888_v38 = vadd.f32 %v887_v34, %v837_v33 }
 0xdcf   :  { %v890_v35 = vpop.f32.mrb[22].mxu1 }
 0xdd0   :  { %v891_v39 = vadd.f32 %v890_v35, %v837_v33  ;;  %v1643_v41 = vpop.f32.mrb[23].mxu1 }
 0xdd2   :  { %v1748_v43 = vpack.i.bf16 %v891_v39, %v888_v38  ;;  %v2197_v44 = vpack.c.bf16 %v891_v39, %v888_v38 }
 0xdd4   :  { %1749 = vrot.lane.b32.xlu0 %v1748_v43, %s1868_s30  ;;  %906 = vrot.lane.b32.xlu1 %v2197_v44, %s1869_s10 }
 0xdd5   :  { %1648 = vmatprep.mubr.msk.bf16.mxu1 %vm238_vm4, %v2197_v44 }
 0xe46   :  { %v1750_v46 = vpop.permute.xlu0 %1749  ;;  %v907_v23 = vpop.permute.xlu1 %906 }
 0xe47   :  { %v1752_v42 = vunpack.i.h.bf16 %v1750_v46  ;;  %v1751_v24 = vunpack.i.l.bf16 %v1750_v46  ;;  %v917_v48 = vsel %vm238_vm4, %v907_v23, 0  ;;  %1722 = vmatprep.subr.msk.bf16.mxu1 %vm238_vm4, %v907_v23 }
 0xe48   :  { %1645 = vmatpush3.bf16.xpose.msra.mxu1 %v917_v48 }
 0xe49   :  { %v903_v49 = vpack.c.bf16 %v1752_v42, %v1751_v24 }
 0xe4b   :  { %908 = vrot.lane.b32.xlu1 %v903_v49, %s1869_s10 }
 0xebd   :  { %v909_v50 = vpop.permute.xlu1 %908 }
 0xebe   :  { %v920_v51 = vsel %vm238_vm4, %v909_v50, 0  ;;  %1723 = vmatprep.subr.msk.bf16.mxu1 %vm238_vm4, %v909_v50 }
 0xebf   :  { %1647 = vmatpush3.bf16.xpose.msra.mxu1 %v920_v51 }
 0xec0   :  { %1668 = vmatprep.subr.bf16.mxu1 %v1866_v5 }
 0xec6   :  { %1649 = vmatmul.mubr.msk.bf16.vlgmr.msra.gmra.mrb[24].mxu1 %vm238_vm4, %v903_v49 }
 0xec7   :  { %1672 = vmatprep.mubr.msk.bf16.mxu1 %vm1867_vm3, %v1866_v5 }
 0xf99   :  { %v1650_v52 = vpop.f32.mrb[24].mxu1 }
 0xf9a   :  { %v956_v53 = vpop.f32.mrb[25].mxu1  ;;  %v973_v54 = vmul.f32 0.25, %v1650_v52  ;;  %v1771_v52 = vld [vmem:[%s2318_s5 + $0x10] sm:$0xff]  }
 0xf9b   :  { %v971_v55 = vmul.f32 0.25, %v956_v53  ;;  %v1651_v37 = vpop.f32.mrb[26].mxu1  ;;  %v1772_v53 = vld [vmem:[%s2318_s5 + $0x18] sm:$0xff]  }
 0xf9c   :  { %v959_v56 = vpop.f32.mrb[27].mxu1  ;;  %v974_v58 = vmul.f32 0.25, %v1651_v37  ;;  %v977_v63 = vadd.f32 %v973_v54, %v2076_v6 }
 0xf9d   :  { %v972_v57 = vmul.f32 0.25, %v959_v56  ;;  %v975_v47 = vadd.f32 %v971_v55, %v2074_v1 }
 0xf9e   :  { %v985_v61 = vsel %vm173_vm2, %v977_v63, -inf  ;;  %v978_v62 = vadd.f32 %v974_v58, %v2084_v15 }
 0xf9f   :  { %v979_v59 = vsel %vm173_vm2, %v975_v47, -inf  ;;  %v976_v60 = vadd.f32 %v972_v57, %v2079_v9 }
 0xfa0   :  { %980 = vmax.xlane.f32.xlu0 %v979_v59  ;;  %v988_v31 = vsel %vm173_vm2, %v978_v62, -inf }
 0xfa1   :  { %v982_v0 = vsel %vm173_vm2, %v976_v60, -inf }
 0xfa2   :  { %983 = vmax.xlane.f32.xlu1 %v982_v0 }
 0xfa4   :  { %986 = vmax.xlane.f32.xlu0 %v985_v61  ;;  %v1105_v61 = vrot.slane %v2193_v32, %v1993_v40 }
 0xfa8   :  { %989 = vmax.xlane.f32.xlu0 %v988_v31 }
0x102d   :  { %v981_v1 = vpop.xlane.xlu0 %980 }
0x102e   :  { %v991_v2 = vsub.f32 %v975_v47, %v981_v1 }
0x102f   :  { %v984_v3 = vpop.xlane.xlu1 %983 }
0x1030   :  { %v995_v9 = vmul.f32 1.442695, %v991_v2  ;;  %v992_v10 = vsub.f32 %v976_v60, %v984_v3 }
0x1031   :  { %v987_v7 = vpop.xlane.xlu0 %986 }
0x1032   :  { %v993_v8 = vsub.f32 %v977_v63, %v987_v7  ;;  %v997_v18 = vmul.f32 1.442695, %v992_v10 }
0x1034   :  { %v999_v6 = vmul.f32 1.442695, %v993_v8 }
0x1035   :  { %v990_v11 = vpop.xlane.xlu0 %989 }
0x1036   :  { %1811 = vpow2.f32 %v999_v6  ;;  %v994_v14 = vsub.f32 %v978_v62, %v990_v11 }
0x1037   :  { %1813 = vpow2.f32 %v995_v9 }
0x1038   :  { %v1001_v19 = vmul.f32 1.442695, %v994_v14 }
0x103a   :  { %1815 = vpow2.f32 %v1001_v19 }
0x103b   :  { %1817 = vpow2.f32 %v997_v18 }
0x1040   :  { %v1812_v15 = vpop.eup %1811 }
0x1041   :  { %v1009_v20 = vsel %vm173_vm2, %v1812_v15, 0.0  ;;  %v1814_v21 = vpop.eup %1813 }
0x1042   :  { %1010 = vadd.xlane.f32.xlu1 %v1009_v20  ;;  %v1003_v27 = vsel %vm173_vm2, %v1814_v21, 0.0 }
0x1044   :  { %v1816_v22 = vpop.eup %1815 }
0x1045   :  { %v1012_v25 = vsel %vm173_vm2, %v1816_v22, 0.0  ;;  %v1818_v30 = vpop.eup %1817 }
0x1046   :  { %1013 = vadd.xlane.f32.xlu0 %v1012_v25  ;;  %1004 = vadd.xlane.f32.xlu1 %v1003_v27  ;;  %v1006_v33 = vsel %vm173_vm2, %v1818_v30, 0.0  ;;  %v1774_v25 = vld [vmem:[%s2319_s6 + $0x18] sm:$0xff]  }
0x104a   :  { %1007 = vadd.xlane.f32.xlu0 %v1006_v33 }
0x1057   :  { %1025 = vrot.lane.b32.xlu1 %v2197_v44, %s1871_s1 }
0x1060   :  { %1027 = vrot.lane.b32.xlu0 %v903_v49, %s1871_s1 }
0x10cf   :  { %v1011_v34 = vpop.xlane.xlu1 %1010 }
0x10d3   :  { %v1014_v26 = vpop.xlane.xlu0 %1013  ;;  %v1005_v35 = vpop.xlane.xlu1 %1004 }
0x10d4   :  { %1819 = vrcp.f32 %v1014_v26 }
0x10d5   :  { %1821 = vrcp.f32 %v1005_v35 }
0x10d6   :  { %1823 = vrcp.f32 %v1011_v34 }
0x10d7   :  { %v1008_v38 = vpop.xlane.xlu0 %1007  ;;  %v1026_v39 = vpop.permute.xlu1 %1025 }
0x10d8   :  { %1825 = vrcp.f32 %v1008_v38  ;;  %1652 = vmatprep.subr.bf16.mxu0 %v1026_v39  ;;  %v1193_v38 = vrot.slane %v2193_v32, %v2022_v13  ;;  %v1776_v13 = vld [vmem:[%s2320_s7 + $0x28] sm:$0xff]  }
0x10d9   :  { %1653 = vmatpush3.bf16.msra.mxu0 %v1026_v39 }
0x10db   :  { %v1028_v41 = vpop.permute.xlu0 %1027 }
0x10dc   :  { %1654 = vmatprep.subr.bf16.mxu0 %v1028_v41 }
0x10dd   :  { %1655 = vmatpush3.bf16.msra.mxu0 %v1028_v41 }
0x10de   :  { %1660 = vmatprep.subr.bf16.mxu0 %v1866_v5  ;;  %v1820_v43 = vpop.eup %1819 }
0x10df   :  { %v1822_v44 = vpop.eup %1821  ;;  %v1022_v42 = vmul.f32 %v1820_v43, %v1816_v22 }
0x10e0   :  { %v1824_v46 = vpop.eup %1823  ;;  %v1019_v24 = vmul.f32 %v1822_v44, %v1814_v21 }
0x10e1   :  { %v1021_v49 = vmul.f32 %v1824_v46, %v1812_v15 }
0x10e2   :  { %v1826_v23 = vpop.eup %1825 }
0x10e3   :  { %v1020_v48 = vmul.f32 %v1826_v23, %v1818_v30  ;;  %v1024_v51 = vpack.c.bf16 %v1022_v42, %v1021_v49  ;;  %v1199_v23 = vrot.slane %v2193_v32, %v2027_v17  ;;  %v1777_v17 = vld [vmem:[%s2320_s7 + $0x30] sm:$0xff]  }
0x10e5   :  { %v1023_v50 = vpack.c.bf16 %v1020_v48, %v1019_v24 }
0x10e7   :  { %1656 = vmatprep.mubr.msk.bf16.mxu0 %vm173_vm2, %v1023_v50  ;;  %v1775_v50 = vld [vmem:[%s2320_s7 + $0x20] sm:$0xff]  }
0x10e8   :  { %1657 = vmatmul.mubr.msk.bf16.vlgmr.msra.gmra.mrb[8].mxu0 %vm173_vm2, %v1024_v51  ;;  %v1778_v51 = vld [vmem:[%s2320_s7 + $0x38] sm:$0xff]   ;;  %s1872_s7 = smov [#allocation2]  }
0x10e9   :  { %1664 = vmatprep.mubr.msk.bf16.mxu0 %vm1867_vm3, %v1866_v5  ;;  %1661 = vmatpush3.bf16.msra.mxu0 %v1771_v52  ;;  %v1211_v52 = vrot.slane %v2193_v32, %v628_v4  ;;  %s1415_s23 = sshll.u32 %s1872_s7, 4  ;;  %s1416_s23 = int_to_ptr.vmem [resolvable:$true] %s1415_s23 }
0x10ea   :  { %1662 = vmatprep.subr.bf16.mxu0 %v1866_v5  ;;  %s1839_s2 = scalar_lea.vmem %s1416_s23, 256  ;;  %p1844_p1 = scmp.lt.s32.totalorder %s1416_s23, %s1416_s23 }
0x10eb   :  { %p1840_p0 = scmp.ne.s32.totalorder %s1416_s23, %s1839_s2  ;;  %p1845_p2 = scmp.lt.s32.totalorder %s1839_s2, %s1839_s2 }
0x10ed   :  { %1663 = vmatpush3.bf16.msra.mxu0 %v1772_v53  ;;  %p1846_p3 = por %p1845_p2, %p1844_p1 }
0x10ee   :  { %1676 = vmatprep.subr.bf16.mxu0 %v1866_v5 }
0x10ef   :  { %p1847_p4 = pnand %p1846_p3, %p1840_p0 }
0x11bb   :  { %v1658_v54 = vpop.f32.mrb[8].mxu0 }
0x11bc   :  { %v1071_v55 = vpop.f32.mrb[9].mxu0 }
0x11bd   :  { %v1659_v37 = vpop.f32.mrb[10].mxu0 }
0x11be   :  { %v1753_v56 = vpack.i.bf16 %v1659_v37, %v1658_v54  ;;  %v1074_v57 = vpop.f32.mrb[11].mxu0 }
0x11c0   :  { %1754 = vrot.lane.b32.xlu1 %v1753_v56, %s1870_s13 }
0x1232   :  { %v1755_v47 = vpop.permute.xlu1 %1754 }
0x1233   :  { %v1757_v58 = vunpack.i.h.bf16 %v1755_v47  ;;  %v1756_v59 = vunpack.i.l.bf16 %v1755_v47 }
0x1235   :  { %v1094_v60 = vsel %vm238_vm4, %v1071_v55, %v1756_v59  ;;  %v1095_v63 = vsel %vm238_vm4, %v1074_v57, %v1757_v58 }
0x1236   :  { %v1096_v0 = vpack.c.bf16 %v1095_v63, %v1094_v60 }
0x1238   :  { %1665 = vmatmul.mubr.msk.bf16.vlgmr.msra.gmra.mrb[12].mxu0 %vm173_vm2, %v1096_v0 }
0x1239   :  { %1684 = vmatprep.mubr.msk.bf16.mxu0 %vm1867_vm3, %v1866_v5  ;;  %1677 = vmatpush3.bf16.msra.mxu0 %v1775_v50  ;;  %v1405_v50 = vrot.slane %v2193_v32, %v822_v16 }
0x123a   :  { %1678 = vmatprep.subr.bf16.mxu0 %v1866_v5 }
0x123d   :  { %1679 = vmatpush3.bf16.msra.mxu0 %v1776_v13 }
0x123e   :  { %1680 = vmatprep.subr.bf16.mxu0 %v1866_v5 }
0x1241   :  { %1681 = vmatpush3.bf16.msra.mxu0 %v1777_v17 }
0x1242   :  { %1682 = vmatprep.subr.bf16.mxu0 %v1866_v5 }
0x1245   :  { %1683 = vmatpush3.bf16.msra.mxu0 %v1778_v51 }
0x130b   :  { %v1155_v62 = vpop.f32.mrb[12].mxu0 }
0x130c   :  { %v1156_v31 = vadd.f32 %v1155_v62, %v1105_v61  ;;  %v1666_v1 = vpop.f32.mrb[13].mxu0 }
0x130d   :  { %v1158_v2 = vpop.f32.mrb[14].mxu0 }
0x130e   :  { %v1159_v3 = vadd.f32 %v1158_v2, %v1105_v61  ;;  %v1667_v7 = vpop.f32.mrb[15].mxu0  ;;  %v1162_v8 = vadd.f32 %v1156_v31, %v2183_v28 }
0x1310   :  { %v1164_v9 = vsel %vm173_vm2, %v1162_v8, 0.0  ;;  %v1163_v10 = vadd.f32 %v1159_v3, %v2185_v29  ;;  %v1773_v29 = vld [vmem:[%s2319_s6 + $0x10] sm:$0xff]  }
0x1311   :  { %1165 = vadd.xlane.f32.xlu1 %v1164_v9  ;;  %1669 = vmatpush3.bf16.msra.mxu1 %v1773_v29 }
0x1312   :  { %v1167_v6 = vsel %vm173_vm2, %v1163_v10, 0.0  ;;  %1670 = vmatprep.subr.bf16.mxu1 %v1866_v5 }
0x1313   :  { %1168 = vadd.xlane.f32.xlu0 %v1167_v6 }
0x1315   :  { %1671 = vmatpush3.bf16.msra.mxu1 %v1774_v25 }
0x139e   :  { %v1166_v11 = vpop.xlane.xlu1 %1165 }
0x139f   :  { %v1170_v14 = vmul.f32 0.03125, %v1166_v11  ;;  %v1299_v11 = vrot.slane %v2193_v32, %v715_v45 }
0x13a0   :  { %v1169_v18 = vpop.xlane.xlu0 %1168 }
0x13a1   :  { %v1172_v40 = vsub.f32 %v1162_v8, %v1170_v14  ;;  %v1171_v19 = vmul.f32 0.03125, %v1169_v18 }
0x13a3   :  { %v1173_v15 = vsub.f32 %v1163_v10, %v1171_v19  ;;  %v1174_v20 = vmul.f32 %v1172_v40, %v1172_v40 }
0x13a5   :  { %v1176_v21 = vsel %vm173_vm2, %v1174_v20, 0.0  ;;  %v1175_v22 = vmul.f32 %v1173_v15, %v1173_v15 }
0x13a6   :  { %1177 = vadd.xlane.f32.xlu0 %v1176_v21 }
0x13a7   :  { %v1179_v28 = vsel %vm173_vm2, %v1175_v22, 0.0 }
0x13a8   :  { %1180 = vadd.xlane.f32.xlu1 %v1179_v28 }
0x1433   :  { %v1178_v27 = vpop.xlane.xlu0 %1177 }
0x1434   :  { %v1182_v30 = vmul.f32 0.03125, %v1178_v27 }
0x1435   :  { %v1181_v33 = vpop.xlane.xlu1 %1180 }
0x1436   :  { %v1184_v34 = vadd.f32 1e-12, %v1182_v30  ;;  %v1183_v26 = vmul.f32 0.03125, %v1181_v33 }
0x1438   :  { %1827 = vrsqrt.f32 %v1184_v34  ;;  %v1185_v35 = vadd.f32 1e-12, %v1183_v26 }
0x143a   :  { %1829 = vrsqrt.f32 %v1185_v35 }
0x1442   :  { %v1828_v39 = vpop.eup %1827 }
0x1443   :  { %v1188_v41 = vmul.f32 %v1828_v39, %v1172_v40 }
0x1444   :  { %v1830_v43 = vpop.eup %1829 }
0x1445   :  { %v1194_v44 = vmul.f32 %v1193_v38, %v1188_v41  ;;  %v1189_v46 = vmul.f32 %v1830_v43, %v1173_v15 }
0x1447   :  { %v1195_v42 = vmul.f32 %v1193_v38, %v1189_v46  ;;  %v1200_v24 = vadd.f32 %v1199_v23, %v1194_v44 }
0x1449   :  { %v1201_v48 = vadd.f32 %v1199_v23, %v1195_v42 }
0x144b   :  { %v1202_v49 = vpack.c.bf16 %v1201_v48, %v1200_v24 }
0x144d   :  { %1673 = vmatmul.mubr.msk.bf16.vlgmr.msra.gmra.mrb[28].mxu1 %vm173_vm2, %v1202_v49 }
0x1520   :  { %v1261_v53 = vpop.f32.mrb[28].mxu1 }
0x1521   :  { %v1262_v54 = vadd.f32 %v1261_v53, %v1211_v52  ;;  %v1674_v55 = vpop.f32.mrb[29].mxu1 }
0x1522   :  { %v1264_v37 = vpop.f32.mrb[30].mxu1 }
0x1523   :  { %v1270_v56 = vmul.f32 0.044715, %v1262_v54  ;;  %v1265_v57 = vadd.f32 %v1264_v37, %v1211_v52  ;;  %v1675_v47 = vpop.f32.mrb[31].mxu1  ;;  %v1268_v3 = vmul.f32 0.5, %v1262_v54 }
0x1525   :  { %v1272_v58 = vmul.f32 %v1270_v56, %v1262_v54  ;;  %v1271_v59 = vmul.f32 0.044715, %v1265_v57  ;;  %v1269_v7 = vmul.f32 0.5, %v1265_v57 }
0x1527   :  { %v1274_v60 = vmul.f32 %v1272_v58, %v1262_v54  ;;  %v1273_v63 = vmul.f32 %v1271_v59, %v1265_v57 }
0x1529   :  { %v1276_v0 = vadd.f32 %v1274_v60, %v1262_v54  ;;  %v1275_v61 = vmul.f32 %v1273_v63, %v1265_v57 }
0x152b   :  { %v1278_v62 = vmul.f32 0.7978846, %v1276_v0  ;;  %v1277_v5 = vadd.f32 %v1275_v61, %v1265_v57 }
0x152d   :  { %1831 = vtanh.f32 %v1278_v62  ;;  %v1279_v31 = vmul.f32 0.7978846, %v1277_v5 }
0x152f   :  { %1833 = vtanh.f32 %v1279_v31 }
0x1537   :  { %v1832_v1 = vpop.eup %1831 }
0x1538   :  { %v1282_v4 = vadd.f32 1.0, %v1832_v1 }
0x1539   :  { %v1834_v2 = vpop.eup %1833 }
0x153a   :  { %v1283_v8 = vadd.f32 1.0, %v1834_v2  ;;  %v1284_v9 = vmul.f32 %v1282_v4, %v1268_v3 }
0x153c   :  { %v1285_v10 = vmul.f32 %v1283_v8, %v1269_v7 }
0x153e   :  { %v1286_v6 = vpack.c.bf16 %v1285_v10, %v1284_v9 }
0x1540   :  { %1685 = vmatmul.mubr.msk.bf16.vlgmr.msra.gmra.mrb[16].mxu0 %vm741_vm9, %v1286_v6 }
0x1613   :  { %v1361_v14 = vpop.f32.mrb[16].mxu0 }
0x1614   :  { %v1362_v18 = vadd.f32 %v1361_v14, %v1299_v11  ;;  %v1686_v40 = vpop.f32.mrb[17].mxu0 }
0x1615   :  { %v1364_v19 = vpop.f32.mrb[18].mxu0 }
0x1616   :  { %v1365_v15 = vadd.f32 %v1364_v19, %v1299_v11  ;;  %v1687_v20 = vpop.f32.mrb[19].mxu0  ;;  %v1368_v21 = vadd.f32 %v1362_v18, %v1200_v24  ;;  %v1399_v24 = vrot.slane %v2193_v32, %v816_v12 }
0x1618   :  { %v1370_v22 = vsel %vm173_vm2, %v1368_v21, 0.0  ;;  %v1369_v28 = vadd.f32 %v1365_v15, %v1201_v48 }
0x1619   :  { %1371 = vadd.xlane.f32.xlu0 %v1370_v22 }
0x161a   :  { %v1373_v29 = vsel %vm173_vm2, %v1369_v28, 0.0 }
0x161b   :  { %1374 = vadd.xlane.f32.xlu1 %v1373_v29 }
0x16a6   :  { %v1372_v25 = vpop.xlane.xlu0 %1371 }
0x16a7   :  { %v1376_v27 = vmul.f32 0.03125, %v1372_v25 }
0x16a8   :  { %v1375_v30 = vpop.xlane.xlu1 %1374 }
0x16a9   :  { %v1378_v33 = vsub.f32 %v1368_v21, %v1376_v27  ;;  %v1377_v34 = vmul.f32 0.03125, %v1375_v30 }
0x16ab   :  { %v1379_v45 = vsub.f32 %v1369_v28, %v1377_v34  ;;  %v1380_v26 = vmul.f32 %v1378_v33, %v1378_v33 }
0x16ad   :  { %v1382_v35 = vsel %vm173_vm2, %v1380_v26, 0.0  ;;  %v1381_v38 = vmul.f32 %v1379_v45, %v1379_v45 }
0x16ae   :  { %1383 = vadd.xlane.f32.xlu0 %v1382_v35 }
0x16af   :  { %v1385_v39 = vsel %vm173_vm2, %v1381_v38, 0.0 }
0x16b0   :  { %1386 = vadd.xlane.f32.xlu1 %v1385_v39 }
0x173b   :  { %v1384_v41 = vpop.xlane.xlu0 %1383 }
0x173c   :  { %v1388_v43 = vmul.f32 0.03125, %v1384_v41 }
0x173d   :  { %v1387_v44 = vpop.xlane.xlu1 %1386 }
0x173e   :  { %v1390_v46 = vadd.f32 1e-12, %v1388_v43  ;;  %v1389_v23 = vmul.f32 0.03125, %v1387_v44 }
0x1740   :  { %1835 = vrsqrt.f32 %v1390_v46  ;;  %v1391_v42 = vadd.f32 1e-12, %v1389_v23 }
0x1742   :  { %1837 = vrsqrt.f32 %v1391_v42 }
0x174a   :  { %v1836_v48 = vpop.eup %1835 }
0x174b   :  { %v1394_v49 = vmul.f32 %v1836_v48, %v1378_v33 }
0x174c   :  { %v1838_v13 = vpop.eup %1837 }
0x174d   :  { %v1395_v17 = vmul.f32 %v1838_v13, %v1379_v45  ;;  %v1400_v51 = vmul.f32 %v1399_v24, %v1394_v49 }
0x174f   :  { %v1401_v52 = vmul.f32 %v1399_v24, %v1395_v17  ;;  %v1406_v53 = vadd.f32 %v1405_v50, %v1400_v51 }
0x1751   :  { %v1407_v54 = vadd.f32 %v1405_v50, %v1401_v52  ;;  %1408 = vst.msk [vmem:[#allocation2] sm:$0xff] %vm173_vm2, %v1406_v53 }
0x1753   :  { %1409 = vst.msk [vmem:[#allocation2 + $0x8] sm:$0xff] %vm173_vm2, %v1407_v54 }
0x1754   :  { %1850 = shalt.err (!%p1847_p4)
}
0x1755   :  { %s1851_s3 = scalar_lea.hbm %s2322_s9, 256 }
0x1756   :  { %p1852_p5 = scmp.ne.s32.totalorder %s2322_s9, %s1851_s3  ;;  %p1855_p6 = scmp.lt.u32.totalorder %s1851_s3, %s2322_s9 }
0x1758   :  { %p1857_p7 = pnand %p1855_p6, %p1852_p5 }
0x175a   :  { %1860 = shalt.err (!%p1857_p7)
}
0x175b   :  { %s1873_s29 = smov 128   ;;  %s1874_s11 = smov 8  }
0x175c   :  { %1421 = dma.vmem_to_hbm [thread:$0]  %s1416_s23, 256, %s2322_s9, [#allocation3], %s1873_s29, %s1873_s29, %s1874_s11  }
0x175d   :  { %1861 = dma.done.wait [#allocation3], 256  }
0x175e   :  { %1862 = vsyncadd [#allocation3], 4294967040 }
0x175f   :  { %1425 = vsyncpa [#allocation3], 1 }

</bundles_post_ra>
